<compile_context>
chip_gen: v7x
topology: tpu7x:2x2x1
jax: 0.10.0
libtpu: 0.0.40
codegen_flags: <defaults>
</compile_context>

<pallas_src>
import functools

import jax
import jax.numpy as jnp
from jax.experimental import pallas as pl
from jax.experimental.pallas import tpu as pltpu


# ---------------------------------------------------------------------------
# Kernel: one SAGE layer (optionally with the fc(hidden, 1) epilogue fused in)
# ---------------------------------------------------------------------------
def _sage_layer_kernel(A_ref, invdeg_ref, xsrc_ref, xself_ref, wl_ref, wr_ref,
                       b_ref, mask_ref, *rest, with_fc):
    if with_fc:
        wfc_ref, bfc_ref, out_ref, acc_ref = rest
    else:
        out_ref, acc_ref = rest

    k = pl.program_id(1)

    @pl.when(k == 0)
    def _():
        acc_ref[...] = jnp.zeros_like(acc_ref)

    # Streamed mean-aggregation: accumulate (count A tile) @ (x source tile) in f32 on MXU.
    acc_ref[...] += jnp.dot(A_ref[...], xsrc_ref[...],
                            preferred_element_type=jnp.float32)

    @pl.when(k == pl.num_programs(1) - 1)
    def _():
        # Post-matmul 1/deg row scale (exact integer-valued A accumulation, f32 normalise).
        agg = (acc_ref[...] * invdeg_ref[...]).astype(jnp.bfloat16)      # (TM, F)
        # SAGE update: lin_l(mean_j x_j) + lin_r(x_i). Two dots -> no lane-axis concat.
        h = jnp.dot(agg, wl_ref[...], preferred_element_type=jnp.float32)
        h = h + jnp.dot(xself_ref[...], wr_ref[...],
                        preferred_element_type=jnp.float32)
        h = jnp.maximum(h + b_ref[...], 0.0)                             # bias + ReLU (f32)
        h = h * mask_ref[...]                                            # inverted dropout
        if with_fc:
            # Linear(hidden, 1) on the VPU: broadcast-mul + lane reduction.
            y = jnp.sum(h * wfc_ref[...], axis=-1, keepdims=True) + bfc_ref[...]
            out_ref[...] = y.astype(out_ref.dtype)
        else:
            out_ref[...] = h.astype(out_ref.dtype)


def _sage_layer(A, inv_deg, x, wl, wr, b, mask, *, tm, tk, wfc=None, bfc=None):
    """One pallas_call computing relu(SAGEConv(x)) * mask (optionally followed by fc)."""
    npad, f_in = x.shape
    hidden = wl.shape[1]
    with_fc = wfc is not None

    grid = (npad // tm, npad // tk)

    in_specs = [
        pl.BlockSpec((tm, tk), lambda i, k: (i, k)),          # A tile (bf16, counts)
        pl.BlockSpec((tm, 1), lambda i, k: (i, 0)),           # 1/deg for the row tile
        pl.BlockSpec((tk, f_in), lambda i, k: (k, 0)),        # x of source nodes
        pl.BlockSpec((tm, f_in), lambda i, k: (i, 0)),        # x of destination nodes
        pl.BlockSpec((f_in, hidden), lambda i, k: (0, 0)),    # W_l (aggregate path)
        pl.BlockSpec((f_in, hidden), lambda i, k: (0, 0)),    # W_r (self path)
        pl.BlockSpec((1, hidden), lambda i, k: (0, 0)),       # bias of lin_l
        pl.BlockSpec((tm, hidden), lambda i, k: (i, 0)),      # dropout mask rows
    ]
    args = [A, inv_deg, x, x, wl, wr, b, mask]

    if with_fc:
        in_specs += [
            pl.BlockSpec((1, hidden), lambda i, k: (0, 0)),   # fc weight (row vector)
            pl.BlockSpec((1, 1), lambda i, k: (0, 0)),        # fc bias
        ]
        args += [wfc, bfc]
        out_shape = jax.ShapeDtypeStruct((npad, 1), jnp.float32)
        out_specs = pl.BlockSpec((tm, 1), lambda i, k: (i, 0))
    else:
        out_shape = jax.ShapeDtypeStruct((npad, hidden), jnp.bfloat16)
        out_specs = pl.BlockSpec((tm, hidden), lambda i, k: (i, 0))

    kernel = functools.partial(_sage_layer_kernel, with_fc=with_fc)

    return pl.pallas_call(
        kernel,
        out_shape=out_shape,
        grid=grid,
        in_specs=in_specs,
        out_specs=out_specs,
        scratch_shapes=[pltpu.VMEM((tm, f_in), jnp.float32)],   # A@x accumulator
        compiler_params=pltpu.CompilerParams(
            dimension_semantics=("parallel", "arbitrary"),
            vmem_limit_bytes=32 * 1024 * 1024,
        ),
    )(*args)


# ---------------------------------------------------------------------------
# Plain-JAX glue
# ---------------------------------------------------------------------------
def _round_up(n, m):
    return ((n + m - 1) // m) * m


def build_adjacency(edge_index, num_nodes):
    """Count adjacency A[i, j] = #edges j->i, plus 1/in-degree per destination node."""
    src = edge_index[0]
    dst = edge_index[1]
    counts = jnp.zeros((num_nodes, num_nodes), jnp.float32).at[dst, src].add(1.0)
    deg = counts.sum(axis=1, keepdims=True)
    inv_deg = jnp.where(deg > 0, 1.0 / jnp.maximum(deg, 1.0), 0.0)
    return counts, inv_deg


def mc_dropout_gnn_forward(x, edge_index, params, *, key=None, dropout_p=0.2,
                           training=True, tm=256, tk=512):
    """Forward pass of MCDropoutGNN.  x: (N, in_dim) f32, edge_index: (2, E) int32."""
    if not (0.0 <= dropout_p < 1.0):
        raise ValueError("dropout_p must be in [0, 1)")
    assert tk % tm == 0 and tm % 8 == 0 and tk % 128 == 0

    n, in_dim = x.shape
    hidden = params["wl1"].shape[1]
    hidden_pad = _round_up(hidden, 128)          # lane-dense h1 / masks / weight columns
    npad = _round_up(max(n, tk), tk)

    counts, inv_deg = build_adjacency(edge_index, n)
    A_pad = jnp.pad(counts, ((0, npad - n), (0, npad - n))).astype(jnp.bfloat16)
    invdeg_pad = jnp.pad(inv_deg, ((0, npad - n), (0, 0)))
    x_pad = jnp.pad(x, ((0, npad - n), (0, 0))).astype(jnp.bfloat16)

    if training:
        if key is None:
            key = jax.random.PRNGKey(0)
        k1, k2 = jax.random.split(key)
        keep = 1.0 - dropout_p
        mask1 = jax.random.bernoulli(k1, keep, (npad, hidden_pad)).astype(jnp.float32) / keep
        mask2 = jax.random.bernoulli(k2, keep, (npad, hidden_pad)).astype(jnp.float32) / keep
    else:
        mask1 = jnp.ones((npad, hidden_pad), jnp.float32)
        mask2 = jnp.ones((npad, hidden_pad), jnp.float32)

    def _padw(w, rows, cols):
        return jnp.pad(w, ((0, rows - w.shape[0]), (0, cols - w.shape[1])))

    # Zero-padded weight columns: padded hidden lanes compute exact zeros and are killed
    # by the zero-padded fc weights, so results are bit-identical to the unpadded math.
    wl1 = _padw(params["wl1"], in_dim, hidden_pad).astype(jnp.bfloat16)
    wr1 = _padw(params["wr1"], in_dim, hidden_pad).astype(jnp.bfloat16)
    b1 = _padw(params["bl1"], 1, hidden_pad).astype(jnp.float32)
    wl2 = _padw(params["wl2"], hidden_pad, hidden_pad).astype(jnp.bfloat16)
    wr2 = _padw(params["wr2"], hidden_pad, hidden_pad).astype(jnp.bfloat16)
    b2 = _padw(params["bl2"], 1, hidden_pad).astype(jnp.float32)
    wfc = _padw(params["wfc"].reshape(1, hidden), 1, hidden_pad).astype(jnp.float32)
    bfc = params["bfc"].reshape(1, 1).astype(jnp.float32)

    # Layer 1: relu(SAGEConv(x)) * dropout_mask  (h streamed through HBM as bf16)
    h1 = _sage_layer(A_pad, invdeg_pad, x_pad, wl1, wr1, b1, mask1, tm=tm, tk=tk)
    # Layer 2 + fused Linear(hidden, 1)
    y = _sage_layer(A_pad, invdeg_pad, h1, wl2, wr2, b2, mask2, tm=tm, tk=tk,
                    wfc=wfc, bfc=bfc)

    return y[:n, 0]   # .squeeze() -> (N,)


def init_params(key, in_dim, hidden_dim):
    """Deterministic synthetic weights (shapes match the nn.Module __init__)."""
    ks = jax.random.split(key, 7)
    s_in = 1.0 / jnp.sqrt(in_dim)
    s_h = 1.0 / jnp.sqrt(hidden_dim)
    return {
        # SAGEConv1: lin_l (bias) + lin_r (no bias), stored pre-transposed (in, out)
        "wl1": jax.random.uniform(ks[0], (in_dim, hidden_dim), jnp.float32, -s_in, s_in),
        "bl1": jax.random.uniform(ks[1], (1, hidden_dim), jnp.float32, -s_in, s_in),
        "wr1": jax.random.uniform(ks[2], (in_dim, hidden_dim), jnp.float32, -s_in, s_in),
        # SAGEConv2
        "wl2": jax.random.uniform(ks[3], (hidden_dim, hidden_dim), jnp.float32, -s_h, s_h),
        "bl2": jax.random.uniform(ks[4], (1, hidden_dim), jnp.float32, -s_h, s_h),
        "wr2": jax.random.uniform(ks[5], (hidden_dim, hidden_dim), jnp.float32, -s_h, s_h),
        # fc: Linear(hidden, 1)
        "wfc": jax.random.uniform(ks[6], (hidden_dim, 1), jnp.float32, -s_h, s_h),
        "bfc": jnp.zeros((1, 1), jnp.float32),
    }


def reference_forward_no_dropout(x, edge_index, params):
    """Pure-JAX reference (training=False path) mirroring the kernel's bf16 casts."""
    n = x.shape[0]
    counts, inv_deg = build_adjacency(edge_index, n)
    Ab = counts.astype(jnp.bfloat16)
    xb = x.astype(jnp.bfloat16)

    def layer(xin_b, wl, wr, b):
        agg = jnp.dot(Ab, xin_b, preferred_element_type=jnp.float32) * inv_deg
        h = jnp.dot(agg.astype(jnp.bfloat16), wl.astype(jnp.bfloat16),
                    preferred_element_type=jnp.float32)
        h = h + jnp.dot(xin_b, wr.astype(jnp.bfloat16),
                        preferred_element_type=jnp.float32)
        return jnp.maximum(h + b, 0.0)

    h1 = layer(xb, params["wl1"], params["wr1"], params["bl1"]).astype(jnp.bfloat16)
    h2 = layer(h1, params["wl2"], params["wr2"], params["bl2"])
    return jnp.sum(h2 * params["wfc"].reshape(1, -1), axis=-1) + params["bfc"][0, 0]


if __name__ == "__main__":
    key = jax.random.PRNGKey(0)
    k_x, k_e, k_w, k_d = jax.random.split(key, 4)

    N, IN_DIM, HIDDEN, E = 16, 8, 32, 40
    x = jax.random.normal(k_x, (N, IN_DIM), jnp.float32)
    edge_index = jax.random.randint(k_e, (2, E), 0, N, dtype=jnp.int32)
    params = init_params(k_w, IN_DIM, HIDDEN)

    # Eval-mode run (training=False) checked against the pure-JAX reference.
    y_eval = mc_dropout_gnn_forward(x, edge_index, params, training=False)
    y_eval = jax.block_until_ready(y_eval)
    y_ref = reference_forward_no_dropout(x, edge_index, params)
    assert y_eval.shape == (N,)
    err = float(jnp.max(jnp.abs(y_eval - y_ref)))
    assert jnp.allclose(y_eval, y_ref, atol=2e-2, rtol=2e-2), f"mismatch vs reference: {err}"

    # Training-mode run (MC dropout active via per-layer inverted-dropout masks).
    y_train = mc_dropout_gnn_forward(x, edge_index, params, key=k_d,
                                     dropout_p=0.2, training=True)
    y_train = jax.block_until_ready(y_train)
    assert y_train.shape == (N,)
    assert bool(jnp.all(jnp.isfinite(y_train)))

    print("KERNEL_OK")
</pallas_src>

<mosaic_0001>
module attributes {stable_mosaic.version = 11 : i64} {
  func.func @_sage_layer_kernel(%arg0: i32, %arg1: i32, %arg2: memref<256x512xbf16, #tpu.memory_space<vmem>>, %arg3: memref<256x1xf32, #tpu.memory_space<vmem>>, %arg4: memref<512x8xbf16, #tpu.memory_space<vmem>>, %arg5: memref<256x8xbf16, #tpu.memory_space<vmem>>, %arg6: memref<8x128xbf16, #tpu.memory_space<vmem>>, %arg7: memref<8x128xbf16, #tpu.memory_space<vmem>>, %arg8: memref<1x128xf32, #tpu.memory_space<vmem>>, %arg9: memref<256x128xf32, #tpu.memory_space<vmem>>, %arg10: memref<256x128xbf16, #tpu.memory_space<vmem>>, %arg11: memref<256x8xf32, #tpu.memory_space<vmem>>) attributes {dimension_semantics = [#tpu.dimension_semantics<parallel>, #tpu.dimension_semantics<arbitrary>], iteration_bounds = array<i64: 2, 1>, scalar_prefetch = 0 : i64, scratch_operands = 1 : i64, tpu.core_type = #tpu.core_type<tc>, window_params = [{transform_indices = @transform_0, window_bounds = array<i64: 256, 512>}, {transform_indices = @transform_1, window_bounds = array<i64: 256, 1>}, {transform_indices = @transform_2, window_bounds = array<i64: 512, 8>}, {transform_indices = @transform_3, window_bounds = array<i64: 256, 8>}, {pipeline_mode = #tpu.pipeline_mode<synchronous>, transform_indices = @transform_4, window_bounds = array<i64: 8, 128>}, {pipeline_mode = #tpu.pipeline_mode<synchronous>, transform_indices = @transform_5, window_bounds = array<i64: 8, 128>}, {pipeline_mode = #tpu.pipeline_mode<synchronous>, transform_indices = @transform_6, window_bounds = array<i64: 1, 128>}, {transform_indices = @transform_7, window_bounds = array<i64: 256, 128>}, {transform_indices = @transform_8, window_bounds = array<i64: 256, 128>}]} {
    %c0_i32 = arith.constant 0 : i32
    %0 = arith.cmpi eq, %arg1, %c0_i32 : i32
    %1 = arith.extui %0 : i1 to i32
    %c0_i32_0 = arith.constant 0 : i32
    %2 = arith.cmpi ne, %1, %c0_i32_0 : i32
    scf.if %2 {
      %cst_10 = arith.constant 0.000000e+00 : f32
      %12 = vector.broadcast %cst_10 : f32 to vector<256x8xf32>
      %c0_11 = arith.constant 0 : index
      %c0_12 = arith.constant 0 : index
      %13 = vector.load %arg11[%c0_11, %c0_12] : memref<256x8xf32, #tpu.memory_space<vmem>>, vector<256x8xf32>
      tpu.vector_store %arg11[%c0_11, %c0_12], %12 {strides = array<i32>} : memref<256x8xf32, #tpu.memory_space<vmem>>, vector<256x8xf32>,
    } else {
    }
    %c0 = arith.constant 0 : index
    %c0_1 = arith.constant 0 : index
    %3 = vector.load %arg11[%c0, %c0_1] : memref<256x8xf32, #tpu.memory_space<vmem>>, vector<256x8xf32>
    %c0_2 = arith.constant 0 : index
    %c0_3 = arith.constant 0 : index
    %4 = vector.load %arg2[%c0_2, %c0_3] : memref<256x512xbf16, #tpu.memory_space<vmem>>, vector<256x512xbf16>
    %c0_4 = arith.constant 0 : index
    %c0_5 = arith.constant 0 : index
    %5 = vector.load %arg4[%c0_4, %c0_5] : memref<512x8xbf16, #tpu.memory_space<vmem>>, vector<512x8xbf16>
    %cst = arith.constant dense<0.000000e+00> : vector<256x8xf32>
    %6 = tpu.matmul %4, %5, %cst {dimension_numbers = #tpu.dot_dimension_numbers<[1], [0], [0], [1], [0, 0, 1, 1], [], []>} : vector<256x512xbf16>, vector<512x8xbf16>, vector<256x8xf32> -> vector<256x8xf32>
    %7 = arith.addf %3, %6 : vector<256x8xf32>
    %c0_6 = arith.constant 0 : index
    %c0_7 = arith.constant 0 : index
    %8 = vector.load %arg11[%c0_6, %c0_7] : memref<256x8xf32, #tpu.memory_space<vmem>>, vector<256x8xf32>
    tpu.vector_store %arg11[%c0_6, %c0_7], %7 {strides = array<i32>} : memref<256x8xf32, #tpu.memory_space<vmem>>, vector<256x8xf32>,
    %c0_i32_8 = arith.constant 0 : i32
    %9 = arith.cmpi eq, %arg1, %c0_i32_8 : i32
    %10 = arith.extui %9 : i1 to i32
    %c0_i32_9 = arith.constant 0 : i32
    %11 = arith.cmpi ne, %10, %c0_i32_9 : i32
    scf.if %11 {
      %c0_10 = arith.constant 0 : index
      %c0_11 = arith.constant 0 : index
      %12 = vector.load %arg11[%c0_10, %c0_11] : memref<256x8xf32, #tpu.memory_space<vmem>>, vector<256x8xf32>
      %c0_12 = arith.constant 0 : index
      %c0_13 = arith.constant 0 : index
      %13 = vector.load %arg3[%c0_12, %c0_13] : memref<256x1xf32, #tpu.memory_space<vmem>>, vector<256x1xf32>
      %14 = vector.broadcast %13 : vector<256x1xf32> to vector<256x8xf32>
      %15 = arith.mulf %12, %14 : vector<256x8xf32>
      %16 = arith.truncf %15 : vector<256x8xf32> to vector<256x8xbf16>
      %c0_14 = arith.constant 0 : index
      %c0_15 = arith.constant 0 : index
      %17 = vector.load %arg6[%c0_14, %c0_15] : memref<8x128xbf16, #tpu.memory_space<vmem>>, vector<8x128xbf16>
      %cst_16 = arith.constant dense<0.000000e+00> : vector<256x128xf32>
      %18 = tpu.matmul %16, %17, %cst_16 {dimension_numbers = #tpu.dot_dimension_numbers<[1], [0], [0], [1], [0, 0, 1, 1], [], []>} : vector<256x8xbf16>, vector<8x128xbf16>, vector<256x128xf32> -> vector<256x128xf32>
      %c0_17 = arith.constant 0 : index
      %c0_18 = arith.constant 0 : index
      %19 = vector.load %arg5[%c0_17, %c0_18] : memref<256x8xbf16, #tpu.memory_space<vmem>>, vector<256x8xbf16>
      %c0_19 = arith.constant 0 : index
      %c0_20 = arith.constant 0 : index
      %20 = vector.load %arg7[%c0_19, %c0_20] : memref<8x128xbf16, #tpu.memory_space<vmem>>, vector<8x128xbf16>
      %cst_21 = arith.constant dense<0.000000e+00> : vector<256x128xf32>
      %21 = tpu.matmul %19, %20, %cst_21 {dimension_numbers = #tpu.dot_dimension_numbers<[1], [0], [0], [1], [0, 0, 1, 1], [], []>} : vector<256x8xbf16>, vector<8x128xbf16>, vector<256x128xf32> -> vector<256x128xf32>
      %22 = arith.addf %18, %21 : vector<256x128xf32>
      %c0_22 = arith.constant 0 : index
      %c0_23 = arith.constant 0 : index
      %23 = vector.load %arg8[%c0_22, %c0_23] : memref<1x128xf32, #tpu.memory_space<vmem>>, vector<1x128xf32>
      %24 = vector.broadcast %23 : vector<1x128xf32> to vector<256x128xf32>
      %25 = arith.addf %22, %24 : vector<256x128xf32>
      %cst_24 = arith.constant 0.000000e+00 : f32
      %26 = vector.broadcast %cst_24 : f32 to vector<256x128xf32>
      %27 = arith.maximumf %25, %26 : vector<256x128xf32>
      %c0_25 = arith.constant 0 : index
      %c0_26 = arith.constant 0 : index
      %28 = vector.load %arg9[%c0_25, %c0_26] : memref<256x128xf32, #tpu.memory_space<vmem>>, vector<256x128xf32>
      %29 = arith.mulf %27, %28 : vector<256x128xf32>
      %30 = arith.truncf %29 : vector<256x128xf32> to vector<256x128xbf16>
      %c0_27 = arith.constant 0 : index
      %c0_28 = arith.constant 0 : index
      %31 = vector.load %arg10[%c0_27, %c0_28] : memref<256x128xbf16, #tpu.memory_space<vmem>>, vector<256x128xbf16>
      tpu.vector_store %arg10[%c0_27, %c0_28], %30 {strides = array<i32>} : memref<256x128xbf16, #tpu.memory_space<vmem>>, vector<256x128xbf16>,
    } else {
    }
    return
  }
  func.func @transform_0(%arg0: i32, %arg1: i32) -> (i32, i32) {
    %c0_i32 = arith.constant 0 : i32
    return %arg0, %arg1 : i32, i32
  }
  func.func @transform_1(%arg0: i32, %arg1: i32) -> (i32, i32) {
    %c0_i32 = arith.constant 0 : i32
    %c0_i32_0 = arith.constant 0 : i32
    return %arg0, %c0_i32 : i32, i32
  }
  func.func @transform_2(%arg0: i32, %arg1: i32) -> (i32, i32) {
    %c0_i32 = arith.constant 0 : i32
    %c0_i32_0 = arith.constant 0 : i32
    return %arg1, %c0_i32 : i32, i32
  }
  func.func @transform_3(%arg0: i32, %arg1: i32) -> (i32, i32) {
    %c0_i32 = arith.constant 0 : i32
    %c0_i32_0 = arith.constant 0 : i32
    return %arg0, %c0_i32 : i32, i32
  }
  func.func @transform_4(%arg0: i32, %arg1: i32) -> (i32, i32) {
    %c0_i32 = arith.constant 0 : i32
    %c0_i32_0 = arith.constant 0 : i32
    %c0_i32_1 = arith.constant 0 : i32
    return %c0_i32, %c0_i32_0 : i32, i32
  }
  func.func @transform_5(%arg0: i32, %arg1: i32) -> (i32, i32) {
    %c0_i32 = arith.constant 0 : i32
    %c0_i32_0 = arith.constant 0 : i32
    %c0_i32_1 = arith.constant 0 : i32
    return %c0_i32, %c0_i32_0 : i32, i32
  }
  func.func @transform_6(%arg0: i32, %arg1: i32) -> (i32, i32) {
    %c0_i32 = arith.constant 0 : i32
    %c0_i32_0 = arith.constant 0 : i32
    %c0_i32_1 = arith.constant 0 : i32
    return %c0_i32, %c0_i32_0 : i32, i32
  }
  func.func @transform_7(%arg0: i32, %arg1: i32) -> (i32, i32) {
    %c0_i32 = arith.constant 0 : i32
    %c0_i32_0 = arith.constant 0 : i32
    return %arg0, %c0_i32 : i32, i32
  }
  func.func @transform_8(%arg0: i32, %arg1: i32) -> (i32, i32) {
    %c0_i32 = arith.constant 0 : i32
    %c0_i32_0 = arith.constant 0 : i32
    return %arg0, %c0_i32 : i32, i32
  }
}

</mosaic_0001>

<bundles_post_ra>
// kernel: tpu_custom_call.1
= control target key start
LH: loop header
LB: loop body
LE: loop exit
PB: predicated region body
PF: predicated region fallthrough
CT: control target
= control target key end

     0   :  { %s4587_s0 = inlined_call_operand.vmem [shape: bf16[512,512], index: 0, kind: input, shape index: {}]   ;;  %s4588_s1 = inlined_call_operand.vmem [shape: f32[512,1], index: 1, kind: input, shape index: {}]   ;;  %s4589_s2 = inlined_call_operand.vmem [shape: bf16[512,8], index: 2, kind: input, shape index: {}]   ;;  %s4590_s3 = inlined_call_operand.vmem [shape: bf16[512,8], index: 3, kind: input, shape index: {}]   ;;  %s4591_s4 = inlined_call_operand.vmem [shape: bf16[8,128], index: 4, kind: input, shape index: {}]   ;;  %s4592_s5 = inlined_call_operand.vmem [shape: bf16[8,128], index: 5, kind: input, shape index: {}]   ;;  %s4593_s6 = inlined_call_operand.vmem [shape: f32[1,128], index: 6, kind: input, shape index: {}]   ;;  %s4594_s7 = inlined_call_operand.hbm [shape: f32[512,128], index: 7, kind: input, shape index: {}]   ;;  %s4595_s8 = inlined_call_operand.hbm [shape: bf16[512,128], index: 8, kind: output, shape index: {}]  }
   0x1   :  { %4597 = sst [smem:[#allocation9_spill]] %s4594_s7 }
   0x2   :  { %13 = vsyncpa [#allocation4], 0 }
   0x3   :  { %15 = vsyncpa [#allocation4 + $0x1], 0 }
   0x4   :  { %16 = vsyncpa [#allocation5], 0 }
   0x5   :  { %18 = vsyncpa [#allocation5 + $0x1], 0  ;;  %s3890_s27 = smov 0   ;;  %s3892_s28 = smov 0  }
   0x6   :  { %s3894_s29 = smov 0   ;;  %s3896_s30 = smov 0  }
   0x7   :  { %s3898_s9 = smov 0   ;;  %s3900_s10 = smov 0  }
   0x8 LB: > { %s2803_s11 = sadd.s32 4294967295, %s3835_s10   ;;  %s2804_s12 = sadd.s32 4294967294, %s3835_s10   ;;  %s3835_s10 = sphi %s3900_s10, %s24_s10   ;;  %s3831_s9 = sphi %s3898_s9, %s4612_s9   ;;  %s3827_s30 = sphi %s3896_s30, %s4611_s30   ;;  %s3823_s29 = sphi %s3894_s29, %s4610_s29   ;;  %s3819_s28 = sphi %s3892_s28, %s4609_s28   ;;  %s3815_s27 = sphi %s3890_s27, %s4608_s27  }
   0x9   : > { %s36_s13 = sadd.s32 1, %s3831_s9  ;;  %s212_s14 = sadd.s32 1, %s3823_s29 }
   0xa   : > { %p38_p0 = scmp.ge.s32.totalorder %s36_s13, 2  ;;  %p219_p1 = scmp.ne.s32.totalorder %s3823_s29, %s3819_s28 }
   0xb   : > { %p220_p2 = scmp.eq.s32.totalorder %s3835_s10, 0  ;;  %p225_p3 = scmp.ne.s32.totalorder %s3819_s28, %s3815_s27 }
   0xc   : > { %s4614_s13 = smov (%p38_p0, %s36_s13), 0  ;;  %p226_p5 = scmp.eq.s32.totalorder %s2803_s11, 0 }
   0xd   : > { %p3931_p4 = por %p220_p2, %p219_p1  ;;  %s209_s16 = ssub.s32 %s3831_s9, %s4614_s13 }
   0xe   : > { %p249_p6 = scmp.eq.s32.totalorder %s2803_s11, 1  ;;  %p210_p7 = scmp.eq.s32.totalorder %s209_s16, 0 }
   0xf   : > { %p3937_p8 = por %p226_p5, %p225_p3  ;;  %p255_p10 = scmp.eq.s32.totalorder %s2804_s12, 1 }
  0x10   : > { %p3941_p9 = por %p249_p6, %p219_p1  ;;  %p3521_p13 = scmp.lt.s32.totalorder %s3835_s10, 2 }
  0x11   : > { %s3946_s19 = scalar_select %p210_p7, %s3823_s29, %s212_s14  }
  0x12   : > { %s4600_s18 = scalar_select %p3941_p9, 1, 0 }
  0x13   : > { %p3948_p11 = por %p255_p10, %p225_p3  ;;  %s326_s21 = sand.u32 1, %s3823_s29  }
  0x14   : > { %s2808_s22 = sshll.u32 %s326_s21, 8  ;;  %s3003_s23 = sshll.u32 %s3831_s9, 12 }
  0x15   : > { %s4601_s20 = scalar_select %p3948_p11, 1, 0 }
  0x16   : > { %s4602_s7 = sld [smem:[#allocation9_spill]]  ;;  %s330_s11 = scalar_lea.vmem [#allocation3], %s2808_s22 }
  0x17   : > { %s337_s12 = sshll.u32 %s330_s11, 4  ;;  %p3965_p0 = pnand %p3521_p13, %p3931_p4  ;;  %s3961_s12 = int_to_ptr.vmem [resolvable:$true] %s337_s12 }
  0x18   : > { %s3970_s16 = scalar_lea.sflag [#allocation4], %s326_s21 }
  0x19   : > { %p3725_p3 = pneg %p3965_p0 }
  0x1c   : > { %s3959_s26 = scalar_lea.hbm %s4602_s7, %s3003_s23  ;;  %s3728_s15 = scalar_lea.hbm %s4602_s7, 8192 }
  0x1d   : > { %s3723_s23 = scalar_lea.hbm %s3959_s26, 4096  ;;  %p3729_p4 = scmp.lt.u32.totalorder %s3959_s26, %s4602_s7 }
  0x1e   : > { %p3724_p2 = scmp.ne.s32.totalorder %s3959_s26, %s3723_s23  ;;  %p3730_p7 = scmp.lt.u32.totalorder %s3728_s15, %s3723_s23 }
  0x1f   : > { %p3732_p13 = scmp.lt.u32.totalorder %s3723_s23, %s3959_s26 }
  0x20   : > { %p3726_p5 = pnand %p3725_p3, %p3724_p2  ;;  %p3731_p10 = por %p3730_p7, %p3729_p4 }
  0x22   : > { %p3727_p6 = pneg %p3726_p5  ;;  %p3733_p12 = por %p3732_p13, %p3731_p10 }
  0x24   : > { %p3734_p1 = pnand %p3733_p12, %p3727_p6 }
  0x26   : > { %3737 = shalt.err (!%p3734_p1)
}
  0x27   : > { %s3738_s21 = scalar_lea.vmem %s3961_s12, 4096  ;;  %s3837_s22 = smov [#allocation3]  }
  0x28   : > { %p3739_p2 = scmp.ne.s32.totalorder %s3961_s12, %s3738_s21  ;;  %s3743_s24 = sshll.u32 %s3837_s22, 4  ;;  %s3744_s24 = int_to_ptr.vmem [resolvable:$false] %s3743_s24 }
  0x29   : > { %s3745_s25 = scalar_lea.vmem %s3744_s24, 8192  ;;  %p3746_p9 = scmp.lt.s32.totalorder %s3961_s12, %s3744_s24 }
  0x2a   : > { %p3741_p5 = pnand %p3739_p2, %p3725_p3  ;;  %p3747_p4 = scmp.lt.s32.totalorder %s3745_s25, %s3738_s21 }
  0x2c   : > { %p3742_p11 = pneg %p3741_p5  ;;  %p3748_p7 = por %p3747_p4, %p3746_p9 }
  0x2e   : > { %p3749_p10 = pnand %p3748_p7, %p3742_p11 }
  0x30   : > { %3752 = shalt.err (!%p3749_p10)
}
  0x31   : > { %s3838_s23 = smov 128   ;;  %s3839_s15 = smov 8  }
  0x32   : > { %3516 = dma.hbm_to_vmem [thread:$0]  (!%p3965_p0), %s3959_s26, 4096, %s3961_s12, %s3970_s16, %s3838_s23, %s3838_s23, %s3839_s15  }
  0x33   : > { %p345_p12 = scmp.lt.s32.totalorder %s3835_s10, 3  ;;  %p4604_p1 = scmp.ge.s32.totalorder %s3835_s10, 1 }
  0x35   : > { %p346_p3 = pnand %p4604_p1, %p345_p12 }
  0x36   : > { %s4002_s11 = sand.u32 (!%p346_p3), 1, %s3819_s28  }
  0x37   : > { %349 = sbr.rel (%p346_p3) target bundleno = 751 (0x2ef), region = 52  ;;  %s2812_s21 = sshll.u32 (!%p346_p3), %s4002_s11, 8 }
  0x38   : > { %s352_s22 = scalar_lea.sflag (!%p346_p3), [#allocation4], %s4002_s11  ;;  %s4006_s24 = scalar_lea.vmem (!%p346_p3), [#allocation3], %s2812_s21 }
  0x3e   : > { %3806 = dma.done.wait (%p3937_p8), %s352_s22, 4096  }
  0x3f   : > { %3808 = vsyncadd (%p3937_p8), %s352_s22, 4294963200  ;;  %v3579_v0 = vld [vmem:[%s4589_s2 + $0x40] sm:$0xff]   ;;  %s2814_s14 = sshll.u32 %s3827_s30, 5  ;;  %v3581_v2 = vld [vmem:[%s4589_s2 + $0x48] sm:$0xff]   ;;  %v3840_v48 = vmov 0   ;;  %vm1979_vm0 = vcmask 1043456  }
  0x40   : > { %v3580_v1 = vld [vmem:[%s4589_s2] sm:$0xff]   ;;  %3459 = vmatprep.subr.bf16.mxu1 %v3579_v0  ;;  %3133 = vmatprep.subr.bf16.mxu0 %v3579_v0  ;;  %v3582_v3 = vld [vmem:[%s4589_s2 + $0x8] sm:$0xff]   ;;  %p415_p8 = scmp.lt.s32.totalorder %s2814_s14, 63  ;;  %v3583_v4 = vld [vmem:[%s4589_s2 + $0x50] sm:$0xff]   ;;  %vm450_vm1 = vcmask 64512   ;;  %p4605_p11 = scmp.ne.s32.totalorder %s4600_s18, 0 }
  0x41   : > { %3467 = vmatpush3.bf16.msra.mxu1 %v3580_v1  ;;  %3134 = vmatpush3.bf16.msra.mxu0 %v3580_v1  ;;  %v3584_v5 = vld [vmem:[%s4589_s2 + $0x10] sm:$0xff]   ;;  %v3585_v6 = vld [vmem:[%s4589_s2 + $0x58] sm:$0xff]   ;;  %v3587_v8 = vld [vmem:[%s4589_s2 + $0x60] sm:$0xff]  }
  0x42   : > { %3460 = vmatprep.subr.bf16.mxu1 %v3581_v2  ;;  %3135 = vmatprep.subr.bf16.mxu0 %v3581_v2  ;;  %s4616_s14 = smov (!%p415_p8, %s2814_s14), 63  ;;  %v3586_v7 = vld [vmem:[%s4589_s2 + $0x18] sm:$0xff]   ;;  %v3588_v9 = vld [vmem:[%s4589_s2 + $0x20] sm:$0xff]   ;;  %v3589_v10 = vld [vmem:[%s4589_s2 + $0x68] sm:$0xff]  }
  0x43   : > { %s3004_s17 = sshll.u32 %s4616_s14, 4  ;;  %v3590_v12 = vld [vmem:[%s4589_s2 + $0x28] sm:$0xff]   ;;  %v3591_v13 = vld [vmem:[%s4589_s2 + $0x70] sm:$0xff]   ;;  %v3593_v15 = vld [vmem:[%s4589_s2 + $0x78] sm:$0xff]   ;;  %3577 = vset.pattern.permute.xlu0 %v3840_v48  ;;  %3578 = vset.pattern.permute.xlu1 %v3840_v48  ;;  %s2818_s23 = sshll.u32 %s4616_s14, 3 }
  0x44   : > { %s4046_s7 = scalar_lea.vmem %s4587_s0, %s3004_s17  ;;  %v3592_v14 = vld [vmem:[%s4589_s2 + $0x30] sm:$0xff]   ;;  %v3594_v16 = vld [vmem:[%s4589_s2 + $0x38] sm:$0xff]   ;;  %v3598_v17 = vld [vmem:[%s4589_s2 + $0xc0] sm:$0xff]   ;;  %s4141_s22 = scalar_lea.vmem %s4588_s1, %s2818_s23 }
  0x45   : > { %3468 = vmatpush3.bf16.msra.mxu1 %v3582_v3  ;;  %3136 = vmatpush3.bf16.msra.mxu0 %v3582_v3  ;;  %v3597_v11 = vld [vmem:[%s4046_s7 + $0x104] ss:$16 sps:$4 sm:$0xff]   ;;  %v3595_v18 = vld [vmem:[%s4046_s7 + $0x100] ss:$16 sps:$4 sm:$0xff]   ;;  %v3603_v21 = vld [vmem:[%s4589_s2 + $0xc8] sm:$0xff]   ;;  %s2820_s12 = sshll.u32 %s4616_s14, 2 }
  0x46   : > { %3461 = vmatprep.subr.bf16.mxu1 %v3583_v4  ;;  %3137 = vmatprep.subr.bf16.mxu0 %v3583_v4  ;;  %v3599_v19 = vld [vmem:[%s4589_s2 + $0x80] sm:$0xff]   ;;  %v3604_v22 = vld [vmem:[%s4589_s2 + $0x88] sm:$0xff]   ;;  %v3608_v23 = vld [vmem:[%s4589_s2 + $0xd0] sm:$0xff]   ;;  %s4211_s23 = scalar_lea.vmem %s4590_s3, %s2820_s12  ;;  %s3037_s17 = sshll.u32 %s3827_s30, 11 }
  0x47   : > { %1251 = vmatprep.mubr.bf16.mxu1 %v3597_v11  ;;  %v3600_v20 = vld [vmem:[%s4046_s7 + $0x124] ss:$16 sps:$4 sm:$0xff]   ;;  %v3602_v24 = vld [vmem:[%s4046_s7 + $0x120] ss:$16 sps:$4 sm:$0xff]   ;;  %v3613_v27 = vld [vmem:[%s4589_s2 + $0xd8] sm:$0xff]   ;;  %s2652_s30 = scalar_lea.sflag [#allocation5], %s4002_s11 }
  0x48   : > { %v3605_v25 = vld [vmem:[%s4046_s7 + $0x144] ss:$16 sps:$4 sm:$0xff]   ;;  %v3614_v28 = vld [vmem:[%s4589_s2 + $0x98] sm:$0xff]   ;;  %v3635_v29 = vld [vmem:[%s4046_s7] ss:$16 sps:$4 sm:$0xff]   ;;  %s3842_s14 = smov [#allocation6]  }
  0x49   : > { %3469 = vmatpush3.bf16.msra.mxu1 %v3584_v5  ;;  %3138 = vmatpush3.bf16.msra.mxu0 %v3584_v5  ;;  %v3609_v26 = vld [vmem:[%s4589_s2 + $0x90] sm:$0xff]   ;;  %v3618_v31 = vld [vmem:[%s4589_s2 + $0xe0] sm:$0xff]   ;;  %v3623_v36 = vld [vmem:[%s4589_s2 + $0xe8] sm:$0xff]   ;;  %s3757_s15 = sshll.u32 %s3842_s14, 4  ;;  %s3758_s15 = int_to_ptr.vmem [resolvable:$false] %s3757_s15 }
  0x4a   : > { %3462 = vmatprep.subr.bf16.mxu1 %v3585_v6  ;;  %3139 = vmatprep.subr.bf16.mxu0 %v3585_v6  ;;  %v3637_v30 = vld [vmem:[%s4046_s7 + $0x4] ss:$16 sps:$4 sm:$0xff]   ;;  %v3607_v32 = vld [vmem:[%s4046_s7 + $0x140] ss:$16 sps:$4 sm:$0xff]   ;;  %v3624_v37 = vld [vmem:[%s4589_s2 + $0xa8] sm:$0xff]  }
  0x4b   : > { %1187 = vmatprep.mubr.bf16.mxu0 %v3637_v30  ;;  %v3641_v33 = vld [vmem:[%s4046_s7 + $0x24] ss:$16 sps:$4 sm:$0xff]   ;;  %v3645_v38 = vld [vmem:[%s4046_s7 + $0x20] ss:$16 sps:$4 sm:$0xff]   ;;  %v3633_v44 = vld [vmem:[%s4589_s2 + $0xf8] sm:$0xff]  }
  0x4c   : > { %v3610_v34 = vld [vmem:[%s4046_s7 + $0x164] ss:$16 sps:$4 sm:$0xff]   ;;  %v3612_v41 = vld [vmem:[%s4046_s7 + $0x160] ss:$16 sps:$4 sm:$0xff]   ;;  %v3634_v45 = vld [vmem:[%s4589_s2 + $0xb8] sm:$0xff]  }
  0x4d   : > { %3470 = vmatpush3.bf16.msra.mxu1 %v3586_v7  ;;  %3140 = vmatpush3.bf16.msra.mxu0 %v3586_v7  ;;  %v3619_v35 = vld [vmem:[%s4589_s2 + $0xa0] sm:$0xff]   ;;  %v3628_v40 = vld [vmem:[%s4589_s2 + $0xf0] sm:$0xff]   ;;  %v1578_v57 = vld [vmem:[%s4141_s22 + $0x8] sm:$0xff] }
  0x4e   : > { %3463 = vmatprep.subr.bf16.mxu1 %v3587_v8  ;;  %3141 = vmatprep.subr.bf16.mxu0 %v3587_v8  ;;  %v3647_v39 = vld [vmem:[%s4046_s7 + $0x44] ss:$16 sps:$4 sm:$0xff]   ;;  %v3651_v46 = vld [vmem:[%s4046_s7 + $0x40] ss:$16 sps:$4 sm:$0xff]   ;;  %v1580_v59 = vld [vmem:[%s4141_s22 + $0x18] sm:$0xff] }
  0x4f   : > { %v3615_v42 = vld [vmem:[%s4046_s7 + $0x184] ss:$16 sps:$4 sm:$0xff]   ;;  %v3617_v49 = vld [vmem:[%s4046_s7 + $0x180] ss:$16 sps:$4 sm:$0xff]   ;;  %v1582_v62 = vld [vmem:[%s4141_s22 + $0x28] sm:$0xff] }
  0x50   : > { %v3629_v43 = vld [vmem:[%s4589_s2 + $0xb0] sm:$0xff]   ;;  %v1577_v54 = vld [vmem:[%s4141_s22] sm:$0xff]  ;;  %v1584_v3 = vld [vmem:[%s4141_s22 + $0x38] sm:$0xff] }
  0x51   : > { %3471 = vmatpush3.bf16.msra.mxu1 %v3588_v9  ;;  %3142 = vmatpush3.bf16.msra.mxu0 %v3588_v9  ;;  %v3653_v47 = vld [vmem:[%s4046_s7 + $0x64] ss:$16 sps:$4 sm:$0xff]   ;;  %v3657_v51 = vld [vmem:[%s4046_s7 + $0x60] ss:$16 sps:$4 sm:$0xff]   ;;  %v1586_v6 = vld [vmem:[%s4141_s22 + $0x48] sm:$0xff] }
  0x52   : > { %3464 = vmatprep.subr.bf16.mxu1 %v3589_v10  ;;  %3143 = vmatprep.subr.bf16.mxu0 %v3589_v10  ;;  %v3620_v50 = vld [vmem:[%s4046_s7 + $0x1a4] ss:$16 sps:$4 sm:$0xff]   ;;  %v3622_v53 = vld [vmem:[%s4046_s7 + $0x1a0] ss:$16 sps:$4 sm:$0xff]   ;;  %v3640_v8 = vld [vmem:[%s4046_s7 + $0xc] ss:$16 sps:$4 sm:$0xff]  }
  0x53   : > { %v3659_v52 = vld [vmem:[%s4046_s7 + $0x84] ss:$16 sps:$4 sm:$0xff]   ;;  %1611 = vperm.xlu0 %3577, %v1577_v54   ;;  %v3663_v58 = vld [vmem:[%s4046_s7 + $0x80] ss:$16 sps:$4 sm:$0xff]   ;;  %v1588_v11 = vld [vmem:[%s4141_s22 + $0x58] sm:$0xff] }
  0x54   : > { %v3625_v55 = vld [vmem:[%s4046_s7 + $0x1c4] ss:$16 sps:$4 sm:$0xff]   ;;  %v3627_v63 = vld [vmem:[%s4046_s7 + $0x1c0] ss:$16 sps:$4 sm:$0xff]   ;;  %v3676_v48 = vld [vmem:[%s4046_s7 + $0xc8] ss:$16 sps:$4 sm:$0xff]  }
  0x55   : > { %3472 = vmatpush3.bf16.msra.mxu1 %v3590_v12  ;;  %3144 = vmatpush3.bf16.msra.mxu0 %v3590_v12  ;;  %v1579_v56 = vld [vmem:[%s4141_s22 + $0x10] sm:$0xff]  ;;  %v1581_v61 = vld [vmem:[%s4141_s22 + $0x20] sm:$0xff] }
  0x56   : > { %3465 = vmatprep.subr.bf16.mxu1 %v3591_v13  ;;  %3145 = vmatprep.subr.bf16.mxu0 %v3591_v13  ;;  %v3665_v60 = vld [vmem:[%s4046_s7 + $0xa4] ss:$16 sps:$4 sm:$0xff]   ;;  %v3669_v2 = vld [vmem:[%s4046_s7 + $0xa0] ss:$16 sps:$4 sm:$0xff]  }
  0x57   : > { %1621 = vperm.xlu1 %3578, %v1579_v56   ;;  %1616 = vperm.xlu0 %3577, %v1578_v57   ;;  %v3630_v0 = vld [vmem:[%s4046_s7 + $0x1e4] ss:$16 sps:$4 sm:$0xff]   ;;  %v3632_v7 = vld [vmem:[%s4046_s7 + $0x1e0] ss:$16 sps:$4 sm:$0xff]   ;;  %v3685_v56 = vld [vmem:[%s4046_s7 + $0x108] ss:$16 sps:$4 sm:$0xff]  }
  0x58   : > { %v1583_v1 = vld [vmem:[%s4141_s22 + $0x30] sm:$0xff]  ;;  %v1585_v5 = vld [vmem:[%s4141_s22 + $0x40] sm:$0xff]  ;;  %v3686_v57 = vld [vmem:[%s4046_s7 + $0x12c] ss:$16 sps:$4 sm:$0xff]  }
  0x59   : > { %3473 = vmatpush3.bf16.msra.mxu1 %v3592_v14  ;;  %3146 = vmatpush3.bf16.msra.mxu0 %v3592_v14  ;;  %v3671_v4 = vld [vmem:[%s4046_s7 + $0xc4] ss:$16 sps:$4 sm:$0xff]   ;;  %v3675_v10 = vld [vmem:[%s4046_s7 + $0xc0] ss:$16 sps:$4 sm:$0xff]   ;;  %v1590_v14 = vld [vmem:[%s4141_s22 + $0x68] sm:$0xff] }
  0x5a   : > { %3466 = vmatprep.subr.bf16.mxu1 %v3593_v15  ;;  %3147 = vmatprep.subr.bf16.mxu0 %v3593_v15  ;;  %v1587_v9 = vld [vmem:[%s4141_s22 + $0x50] sm:$0xff]  ;;  %v1589_v13 = vld [vmem:[%s4141_s22 + $0x60] sm:$0xff]  ;;  %v3638_v15 = vld [vmem:[%s4046_s7 + $0x8] ss:$16 sps:$4 sm:$0xff]  }
  0x5b   : > { %1626 = vperm.xlu1 %3578, %v1580_v59   ;;  %1631 = vperm.xlu0 %3577, %v1581_v61   ;;  %v3677_v12 = vld [vmem:[%s4046_s7 + $0xe4] ss:$16 sps:$4 sm:$0xff]   ;;  %v3712_v59 = vld [vmem:[%s4211_s23 + $0x28] sm:$0xff]  }
  0x5c   : > { %v1599_v30 = vld [vmem:[%s4141_s22 + $0xb0] sm:$0xff]  ;;  %v3689_v61 = vld [vmem:[%s4046_s7 + $0x14c] ss:$16 sps:$4 sm:$0xff]  }
  0x5d   : > { %3474 = vmatpush3.bf16.msra.mxu1 %v3594_v16  ;;  %3148 = vmatpush3.bf16.msra.mxu0 %v3594_v16  ;;  %v3643_v16 = vld [vmem:[%s4046_s7 + $0x2c] ss:$16 sps:$4 sm:$0xff]   ;;  %v3709_v54 = vld [vmem:[%s4211_s23 + $0x10] sm:$0xff]  }
  0x5e   : > { %3245 = vmatprep.subr.bf16.mxu1 %v3598_v17  ;;  %v1591_v17 = vld [vmem:[%s4141_s22 + $0x70] sm:$0xff] }
  0x5f   : > { %1636 = vperm.xlu1 %3578, %v1582_v62   ;;  %1641 = vperm.xlu0 %3577, %v1583_v1   ;;  %v3713_v62 = vld [vmem:[%s4211_s23 + $0x30] sm:$0xff]   ;;  %v3692_v1 = vld [vmem:[%s4046_s7 + $0x16c] ss:$16 sps:$4 sm:$0xff]  }
  0x60   : > { %1252 = vmatmul.mubr.bf16.vlgmr.msra.gmra.mrb[0].mxu1 %v3595_v18  ;;  %1188 = vmatmul.mubr.bf16.vlgmr.msra.gmra.mrb[0].mxu0 %v3635_v29  ;;  %v1592_v18 = vld [vmem:[%s4141_s22 + $0x78] sm:$0xff] }
  0x61   : > { %3246 = vmatpush3.bf16.msra.mxu1 %v3599_v19  ;;  %1259 = vmatprep.mubr.bf16.mxu1 %v3600_v20  ;;  %v3681_v19 = vld [vmem:[%s4046_s7 + $0xe0] ss:$16 sps:$4 sm:$0xff]   ;;  %v3655_v29 = vld [vmem:[%s4046_s7 + $0x6c] ss:$16 sps:$4 sm:$0xff]  }
  0x62   : > { %3247 = vmatprep.subr.bf16.mxu1 %v3603_v21  ;;  %1195 = vmatprep.mubr.bf16.mxu0 %v3641_v33  ;;  %v1593_v20 = vld [vmem:[%s4141_s22 + $0x80] sm:$0xff]  ;;  %v1594_v21 = vld [vmem:[%s4141_s22 + $0x88] sm:$0xff] }
  0x63   : > { %1646 = vperm.xlu1 %3578, %v1584_v3   ;;  %1651 = vperm.xlu0 %3577, %v1585_v5   ;;  %v3658_v33 = vld [vmem:[%s4046_s7 + $0x68] ss:$16 sps:$4 sm:$0xff]  }
  0x64   : > { %v3716_v3 = vld [vmem:[%s4211_s23 + $0x48] sm:$0xff]  }
  0x65   : > { %3248 = vmatpush3.bf16.msra.mxu1 %v3604_v22  ;;  %v3646_v22 = vld [vmem:[%s4046_s7 + $0x28] ss:$16 sps:$4 sm:$0xff]  }
  0x66   : > { %3249 = vmatprep.subr.bf16.mxu1 %v3608_v23  ;;  %v3649_v23 = vld [vmem:[%s4046_s7 + $0x4c] ss:$16 sps:$4 sm:$0xff]   ;;  %v3694_v5 = vld [vmem:[%s4046_s7 + $0x168] ss:$16 sps:$4 sm:$0xff]  }
  0x67   : > { %1656 = vperm.xlu1 %3578, %v1586_v6   ;;  %1661 = vperm.xlu0 %3577, %v1587_v9   ;;  %v3695_v6 = vld [vmem:[%s4046_s7 + $0x18c] ss:$16 sps:$4 sm:$0xff]   ;;  %v3697_v9 = vld [vmem:[%s4046_s7 + $0x188] ss:$16 sps:$4 sm:$0xff]  }
  0x68   : > { %1260 = vmatmul.mubr.bf16.gmra.mrb[4].mxu1 %v3602_v24  ;;  %1196 = vmatmul.mubr.bf16.gmra.mrb[4].mxu0 %v3645_v38  ;;  %v1595_v24 = vld [vmem:[%s4141_s22 + $0x90] sm:$0xff]  ;;  %v1605_v38 = vld [vmem:[%s4141_s22 + $0xe0] sm:$0xff] }
  0x69   : > { %1267 = vmatprep.mubr.bf16.mxu1 %v3605_v25  ;;  %3250 = vmatpush3.bf16.msra.mxu1 %v3609_v26  ;;  %v1596_v25 = vld [vmem:[%s4141_s22 + $0x98] sm:$0xff]  ;;  %v1597_v26 = vld [vmem:[%s4141_s22 + $0xa0] sm:$0xff] }
  0x6a   : > { %3251 = vmatprep.subr.bf16.mxu1 %v3613_v27  ;;  %1203 = vmatprep.mubr.bf16.mxu0 %v3647_v39  ;;  %v1598_v27 = vld [vmem:[%s4141_s22 + $0xa8] sm:$0xff] }
  0x6b   : > { %1666 = vperm.xlu1 %3578, %v1588_v11   ;;  %1671 = vperm.xlu0 %3577, %v1589_v13   ;;  %v3664_v39 = vld [vmem:[%s4046_s7 + $0x88] ss:$16 sps:$4 sm:$0xff]   ;;  %v3719_v11 = vld [vmem:[%s4211_s23 + $0x60] sm:$0xff]  }
  0x6c   : > { %v3700_v13 = vld [vmem:[%s4046_s7 + $0x1a8] ss:$16 sps:$4 sm:$0xff]  }
  0x6d   : > { %3252 = vmatpush3.bf16.msra.mxu1 %v3614_v28  ;;  %v3652_v28 = vld [vmem:[%s4046_s7 + $0x48] ss:$16 sps:$4 sm:$0xff]  }
  0x6e   : > { %3253 = vmatprep.subr.bf16.mxu1 %v3618_v31  ;;  %v1600_v31 = vld [vmem:[%s4141_s22 + $0xb8] sm:$0xff] }
  0x6f   : > { %1676 = vperm.xlu1 %3578, %v1590_v14   ;;  %1681 = vperm.xlu0 %3577, %v1591_v17   ;;  %v3701_v14 = vld [vmem:[%s4046_s7 + $0x1cc] ss:$16 sps:$4 sm:$0xff]   ;;  %v3703_v17 = vld [vmem:[%s4046_s7 + $0x1c8] ss:$16 sps:$4 sm:$0xff]  }
  0x70   : > { %1268 = vmatmul.mubr.bf16.gmra.mrb[8].mxu1 %v3607_v32  ;;  %1204 = vmatmul.mubr.bf16.gmra.mrb[8].mxu0 %v3651_v46  ;;  %v1601_v32 = vld [vmem:[%s4141_s22 + $0xc0] sm:$0xff] }
  0x71   : > { %1275 = vmatprep.mubr.bf16.mxu1 %v3610_v34  ;;  %3254 = vmatpush3.bf16.msra.mxu1 %v3619_v35  ;;  %v1602_v34 = vld [vmem:[%s4141_s22 + $0xc8] sm:$0xff]  ;;  %v1850_v46 = vld [vmem:[%s4592_s5] sm:$0xf] }
  0x72   : > { %3255 = vmatprep.subr.bf16.mxu1 %v3623_v36  ;;  %1211 = vmatprep.mubr.bf16.mxu0 %v3653_v47  ;;  %v3661_v35 = vld [vmem:[%s4046_s7 + $0x8c] ss:$16 sps:$4 sm:$0xff]   ;;  %v1603_v36 = vld [vmem:[%s4141_s22 + $0xd0] sm:$0xff]  ;;  %v1981_v47 = vsel %vm1979_vm0, %v1850_v46, 0 }
  0x73   : > { %1686 = vperm.xlu1 %3578, %v1592_v18   ;;  %1691 = vperm.xlu0 %3577, %v1593_v20   ;;  %v1817_v18 = vld [vmem:[%s4591_s4] sm:$0xf] }
  0x74   : > { %3507 = vmatprep.subr.msk.bf16.mxu0 %vm1979_vm0, %v1850_v46  ;;  %v2193_v20 = vsel %vm1979_vm0, %v1817_v18, 0 }
  0x75   : > { %3256 = vmatpush3.bf16.msra.mxu1 %v3624_v37  ;;  %v1604_v37 = vld [vmem:[%s4141_s22 + $0xd8] sm:$0xff]  ;;  %3392 = vmatpush3.bf16.msra.mxu0 %v1981_v47 }
  0x76   : > { %3257 = vmatprep.subr.bf16.mxu1 %v3628_v40  ;;  %v1606_v40 = vld [vmem:[%s4141_s22 + $0xe8] sm:$0xff]  ;;  %3508 = vmatprep.subr.msk.bf16.mxu0 %vm1979_vm0, %v1817_v18 }
  0x77   : > { %1696 = vperm.xlu1 %3578, %v1594_v21   ;;  %1701 = vperm.xlu0 %3577, %v1595_v24   ;;  %v3706_v21 = vld [vmem:[%s4046_s7 + $0x1e8] ss:$16 sps:$4 sm:$0xff]  }
  0x78   : > { %1276 = vmatmul.mubr.bf16.gmra.mrb[12].mxu1 %v3612_v41  ;;  %1212 = vmatmul.mubr.bf16.gmra.mrb[12].mxu0 %v3657_v51  ;;  %v3667_v41 = vld [vmem:[%s4046_s7 + $0xac] ss:$16 sps:$4 sm:$0xff]  }
  0x79   : > { %1283 = vmatprep.mubr.bf16.mxu1 %v3615_v42  ;;  %3258 = vmatpush3.bf16.msra.mxu1 %v3629_v43  ;;  %v1607_v42 = vld [vmem:[%s4141_s22 + $0xf0] sm:$0xff]  ;;  %v1608_v43 = vld [vmem:[%s4141_s22 + $0xf8] sm:$0xff]  ;;  %v3708_v51 = vld [vmem:[%s4211_s23 + $0x8] sm:$0xff]   ;;  %s2813_s22 = sshll.u32 %s4002_s11, 7 }
  0x7a   : > { %3259 = vmatprep.subr.bf16.mxu1 %v3633_v44  ;;  %1219 = vmatprep.mubr.bf16.mxu0 %v3659_v52  ;;  %v3670_v44 = vld [vmem:[%s4046_s7 + $0xa8] ss:$16 sps:$4 sm:$0xff]   ;;  %s4457_s26 = scalar_lea.vmem [#allocation6], %s2813_s22 }
  0x7b   : > { %1706 = vperm.xlu1 %3578, %v1596_v25   ;;  %1711 = vperm.xlu0 %3577, %v1597_v26   ;;  %v3682_v52 = vld [vmem:[%s4046_s7 + $0xe8] ss:$16 sps:$4 sm:$0xff]   ;;  %s2665_s12 = sshll.u32 %s4457_s26, 4  ;;  %s4536_s12 = int_to_ptr.vmem [resolvable:$true] %s2665_s12 }
  0x7c   : > { %p3760_p13 = scmp.lt.s32.totalorder %s4536_s12, %s3758_s15 }
  0x7d   : > { %3260 = vmatpush3.bf16.msra.mxu1 %v3634_v45  ;;  %v3673_v45 = vld [vmem:[%s4046_s7 + $0xcc] ss:$16 sps:$4 sm:$0xff]  }
  0x7f   : > { %1716 = vperm.xlu1 %3578, %v1598_v27   ;;  %1721 = vperm.xlu0 %3577, %v1599_v30  }
  0x80   : > { %1284 = vmatmul.mubr.bf16.gmra.mrb[16].mxu1 %v3617_v49  ;;  %1220 = vmatmul.mubr.bf16.gmra.mrb[16].mxu0 %v3663_v58  ;;  %v3679_v49 = vld [vmem:[%s4046_s7 + $0xec] ss:$16 sps:$4 sm:$0xff]   ;;  %v3711_v58 = vld [vmem:[%s4211_s23 + $0x20] sm:$0xff]  }
  0x81   : > { %1291 = vmatprep.mubr.bf16.mxu1 %v3620_v50  ;;  %1227 = vmatprep.mubr.bf16.mxu0 %v3665_v60  ;;  %v3707_v50 = vld [vmem:[%s4211_s23] sm:$0xff]   ;;  %v3688_v60 = vld [vmem:[%s4046_s7 + $0x128] ss:$16 sps:$4 sm:$0xff]  }
  0x83   : > { %1726 = vperm.xlu1 %3578, %v1600_v31   ;;  %1731 = vperm.xlu0 %3577, %v1601_v32  }
  0x87   : > { %1736 = vperm.xlu1 %3578, %v1602_v34   ;;  %1741 = vperm.xlu0 %3577, %v1603_v36  }
  0x88   : > { %1292 = vmatmul.mubr.bf16.gmra.mrb[20].mxu1 %v3622_v53  ;;  %1228 = vmatmul.mubr.bf16.gmra.mrb[20].mxu0 %v3669_v2  ;;  %v3683_v53 = vld [vmem:[%s4046_s7 + $0x10c] ss:$16 sps:$4 sm:$0xff]   ;;  %v3715_v2 = vld [vmem:[%s4211_s23 + $0x40] sm:$0xff]  }
  0x89   : > { %1299 = vmatprep.mubr.bf16.mxu1 %v3625_v55  ;;  %1235 = vmatprep.mubr.bf16.mxu0 %v3671_v4  ;;  %v3710_v55 = vld [vmem:[%s4211_s23 + $0x18] sm:$0xff]   ;;  %v3841_v4 = vmov 0.0  }
  0x8a   : > { %451 = vst.msk [vmem:[#allocation2] sm:$0xff] %vm450_vm1, %v3841_v4  ;;  %452 = vst.msk [vmem:[#allocation2 + $0x8] sm:$0xff] %vm450_vm1, %v3841_v4 }
  0x8b   : > { %1746 = vperm.xlu1 %3578, %v1604_v37   ;;  %1751 = vperm.xlu0 %3577, %v1605_v38   ;;  %453 = vst.msk [vmem:[#allocation2 + $0x10] sm:$0xff] %vm450_vm1, %v3841_v4  ;;  %454 = vst.msk [vmem:[#allocation2 + $0x18] sm:$0xff] %vm450_vm1, %v3841_v4 }
  0x8c   : > { %455 = vst.msk [vmem:[#allocation2 + $0x20] sm:$0xff] %vm450_vm1, %v3841_v4  ;;  %456 = vst.msk [vmem:[#allocation2 + $0x28] sm:$0xff] %vm450_vm1, %v3841_v4 }
  0x8d   : > { %457 = vst.msk [vmem:[#allocation2 + $0x30] sm:$0xff] %vm450_vm1, %v3841_v4  ;;  %458 = vst.msk [vmem:[#allocation2 + $0x38] sm:$0xff] %vm450_vm1, %v3841_v4 }
  0x8e   : > { %459 = vst.msk [vmem:[#allocation2 + $0x40] sm:$0xff] %vm450_vm1, %v3841_v4  ;;  %460 = vst.msk [vmem:[#allocation2 + $0x48] sm:$0xff] %vm450_vm1, %v3841_v4 }
  0x8f   : > { %1756 = vperm.xlu1 %3578, %v1606_v40   ;;  %1761 = vperm.xlu0 %3577, %v1607_v42   ;;  %461 = vst.msk [vmem:[#allocation2 + $0x50] sm:$0xff] %vm450_vm1, %v3841_v4  ;;  %462 = vst.msk [vmem:[#allocation2 + $0x58] sm:$0xff] %vm450_vm1, %v3841_v4 }
  0x90   : > { %1300 = vmatmul.mubr.bf16.gmra.mrb[24].mxu1 %v3627_v63  ;;  %1236 = vmatmul.mubr.bf16.gmra.mrb[24].mxu0 %v3675_v10  ;;  %v3714_v63 = vld [vmem:[%s4211_s23 + $0x38] sm:$0xff]   ;;  %463 = vst.msk [vmem:[#allocation2 + $0x60] sm:$0xff] %vm450_vm1, %v3841_v4  ;;  %464 = vst.msk [vmem:[#allocation2 + $0x68] sm:$0xff] %vm450_vm1, %v3841_v4 }
  0x91   : > { %1307 = vmatprep.mubr.bf16.mxu1 %v3630_v0  ;;  %1243 = vmatprep.mubr.bf16.mxu0 %v3677_v12  ;;  %v3691_v0 = vld [vmem:[%s4046_s7 + $0x148] ss:$16 sps:$4 sm:$0xff]   ;;  %465 = vst.msk [vmem:[#allocation2 + $0x70] sm:$0xff] %vm450_vm1, %v3841_v4  ;;  %466 = vst.msk [vmem:[#allocation2 + $0x78] sm:$0xff] %vm450_vm1, %v3841_v4  ;;  %v3698_v10 = vld [vmem:[%s4046_s7 + $0x1ac] ss:$16 sps:$4 sm:$0xff]  }
  0x92   : > { %467 = vst.msk [vmem:[#allocation2 + $0x80] sm:$0xff] %vm450_vm1, %v3841_v4  ;;  %468 = vst.msk [vmem:[#allocation2 + $0x88] sm:$0xff] %vm450_vm1, %v3841_v4  ;;  %v3720_v12 = vld [vmem:[%s4211_s23 + $0x68] sm:$0xff]  }
  0x93   : > { %1766 = vperm.xlu1 %3578, %v1608_v43   ;;  %469 = vst.msk [vmem:[#allocation2 + $0x90] sm:$0xff] %vm450_vm1, %v3841_v4  ;;  %470 = vst.msk [vmem:[#allocation2 + $0x98] sm:$0xff] %vm450_vm1, %v3841_v4 }
  0x94   : > { %471 = vst.msk [vmem:[#allocation2 + $0xa0] sm:$0xff] %vm450_vm1, %v3841_v4  ;;  %472 = vst.msk [vmem:[#allocation2 + $0xa8] sm:$0xff] %vm450_vm1, %v3841_v4 }
  0x95   : > { %473 = vst.msk [vmem:[#allocation2 + $0xb0] sm:$0xff] %vm450_vm1, %v3841_v4  ;;  %474 = vst.msk [vmem:[#allocation2 + $0xb8] sm:$0xff] %vm450_vm1, %v3841_v4 }
  0x96   : > { %475 = vst.msk [vmem:[#allocation2 + $0xc0] sm:$0xff] %vm450_vm1, %v3841_v4  ;;  %476 = vst.msk [vmem:[#allocation2 + $0xc8] sm:$0xff] %vm450_vm1, %v3841_v4 }
  0x97   : > { %477 = vst.msk [vmem:[#allocation2 + $0xd0] sm:$0xff] %vm450_vm1, %v3841_v4  ;;  %478 = vst.msk [vmem:[#allocation2 + $0xd8] sm:$0xff] %vm450_vm1, %v3841_v4 }
  0x98   : > { %1308 = vmatmul.mubr.bf16.gmra.mrb[28].mxu1 %v3632_v7  ;;  %1244 = vmatmul.mubr.bf16.gmra.mrb[28].mxu0 %v3681_v19  ;;  %479 = vst.msk [vmem:[#allocation2 + $0xe0] sm:$0xff] %vm450_vm1, %v3841_v4  ;;  %480 = vst.msk [vmem:[#allocation2 + $0xe8] sm:$0xff] %vm450_vm1, %v3841_v4  ;;  %v3717_v7 = vld [vmem:[%s4211_s23 + $0x50] sm:$0xff]   ;;  %v3704_v19 = vld [vmem:[%s4046_s7 + $0x1ec] ss:$16 sps:$4 sm:$0xff]   ;;  %s3759_s7 = scalar_lea.vmem %s3758_s15, 4096 }
  0x99   : > { %1348 = vmatprep.mubr.bf16.mxu1 %v3640_v8  ;;  %3393 = vmatprep.mubr.msk.bf16.mxu0 %vm450_vm1, %v3707_v50  ;;  %481 = vst.msk [vmem:[#allocation2 + $0xf0] sm:$0xff] %vm450_vm1, %v3841_v4  ;;  %482 = vst.msk [vmem:[#allocation2 + $0xf8] sm:$0xff] %vm450_vm1, %v3841_v4  ;;  %v3718_v8 = vld [vmem:[%s4211_s23 + $0x58] sm:$0xff]  }
  0xa0   : > { %1349 = vmatmul.mubr.bf16.vlgmr.msra.gmra.mrb[32].mxu1 %v3638_v15  ;;  %3394 = vmatmul.mubr.msk.bf16.vlgmr.msra.gmra.mrb[32].mxu0 %vm450_vm1, %v3708_v51  ;;  %v3721_v15 = vld [vmem:[%s4211_s23 + $0x70] sm:$0xff]  }
  0xa1   : > { %1356 = vmatprep.mubr.bf16.mxu1 %v3643_v16  ;;  %3397 = vmatprep.mubr.msk.bf16.mxu0 %vm450_vm1, %v3709_v54  ;;  %v3722_v16 = vld [vmem:[%s4211_s23 + $0x78] sm:$0xff]   ;;  %s4534_s23 = scalar_lea.hbm %s4595_s8, %s3037_s17 }
  0xa2   : > { %3426 = vmatpush3.bf16.msra.mxu0 %v2193_v20 }
  0xa8   : > { %1357 = vmatmul.mubr.bf16.gmra.mrb[36].mxu1 %v3646_v22  ;;  %3398 = vmatmul.mubr.msk.bf16.gmra.mrb[36].mxu0 %vm450_vm1, %v3710_v55 }
  0xa9   : > { %1364 = vmatprep.mubr.bf16.mxu1 %v3649_v23  ;;  %3401 = vmatprep.mubr.msk.bf16.mxu0 %vm450_vm1, %v3711_v58 }
  0xb0   : > { %1365 = vmatmul.mubr.bf16.gmra.mrb[40].mxu1 %v3652_v28  ;;  %3402 = vmatmul.mubr.msk.bf16.gmra.mrb[40].mxu0 %vm450_vm1, %v3712_v59 }
  0xb1   : > { %1372 = vmatprep.mubr.bf16.mxu1 %v3655_v29  ;;  %3405 = vmatprep.mubr.msk.bf16.mxu0 %vm450_vm1, %v3713_v62 }
  0xb8   : > { %1373 = vmatmul.mubr.bf16.gmra.mrb[44].mxu1 %v3658_v33  ;;  %3406 = vmatmul.mubr.msk.bf16.gmra.mrb[44].mxu0 %vm450_vm1, %v3714_v63 }
  0xb9   : > { %1380 = vmatprep.mubr.bf16.mxu1 %v3661_v35  ;;  %3409 = vmatprep.mubr.msk.bf16.mxu0 %vm450_vm1, %v3715_v2 }
  0xc0   : > { %1381 = vmatmul.mubr.bf16.gmra.mrb[48].mxu1 %v3664_v39  ;;  %3410 = vmatmul.mubr.msk.bf16.gmra.mrb[48].mxu0 %vm450_vm1, %v3716_v3 }
  0xc1   : > { %1388 = vmatprep.mubr.bf16.mxu1 %v3667_v41  ;;  %3413 = vmatprep.mubr.msk.bf16.mxu0 %vm450_vm1, %v3717_v7 }
  0xc8   : > { %1389 = vmatmul.mubr.bf16.gmra.mrb[52].mxu1 %v3670_v44  ;;  %3414 = vmatmul.mubr.msk.bf16.gmra.mrb[52].mxu0 %vm450_vm1, %v3718_v8 }
  0xc9   : > { %1396 = vmatprep.mubr.bf16.mxu1 %v3673_v45  ;;  %3417 = vmatprep.mubr.msk.bf16.mxu0 %vm450_vm1, %v3719_v11 }
  0xd0   : > { %1397 = vmatmul.mubr.bf16.gmra.mrb[56].mxu1 %v3676_v48  ;;  %3418 = vmatmul.mubr.msk.bf16.gmra.mrb[56].mxu0 %vm450_vm1, %v3720_v12 }
  0xd1   : > { %1404 = vmatprep.mubr.bf16.mxu1 %v3679_v49  ;;  %3421 = vmatprep.mubr.msk.bf16.mxu0 %vm450_vm1, %v3721_v15 }
  0xd8   : > { %1405 = vmatmul.mubr.bf16.gmra.mrb[60].mxu1 %v3682_v52  ;;  %3422 = vmatmul.mubr.msk.bf16.gmra.mrb[60].mxu0 %vm450_vm1, %v3722_v16 }
  0xd9   : > { %1412 = vmatprep.mubr.bf16.mxu1 %v3683_v53 }
  0xe0   : > { %1413 = vmatmul.mubr.bf16.gmra.mrb[64].mxu1 %v3685_v56 }
  0xe1   : > { %1420 = vmatprep.mubr.bf16.mxu1 %v3686_v57 }
  0xe8   : > { %1421 = vmatmul.mubr.bf16.gmra.mrb[68].mxu1 %v3688_v60 }
  0xe9   : > { %1428 = vmatprep.mubr.bf16.mxu1 %v3689_v61 }
  0xf0   : > { %1429 = vmatmul.mubr.bf16.gmra.mrb[72].mxu1 %v3691_v0 }
  0xf1   : > { %1436 = vmatprep.mubr.bf16.mxu1 %v3692_v1 }
  0xf8   : > { %1437 = vmatmul.mubr.bf16.gmra.mrb[76].mxu1 %v3694_v5 }
  0xf9   : > { %1444 = vmatprep.mubr.bf16.mxu1 %v3695_v6 }
 0x100   : > { %1445 = vmatmul.mubr.bf16.gmra.mrb[80].mxu1 %v3697_v9 }
 0x101   : > { %1452 = vmatprep.mubr.bf16.mxu1 %v3698_v10 }
 0x108   : > { %1453 = vmatmul.mubr.bf16.gmra.mrb[84].mxu1 %v3700_v13 }
 0x109   : > { %1460 = vmatprep.mubr.bf16.mxu1 %v3701_v14 }
 0x110   : > { %1461 = vmatmul.mubr.bf16.gmra.mrb[88].mxu1 %v3703_v17 }
 0x111   : > { %1468 = vmatprep.mubr.bf16.mxu1 %v3704_v19 }
 0x118   : > { %1469 = vmatmul.mubr.bf16.gmra.mrb[92].mxu1 %v3706_v21 }
 0x133   : > { %v3197_v22 = vpop.f32.mrb[0].mxu1  ;;  %v3149_v34 = vpop.f32.mrb[0].mxu0 }
 0x134   : > { %v3198_v23 = vpop.f32.mrb[1].mxu1  ;;  %v3150_v35 = vpop.f32.mrb[1].mxu0 }
 0x135   : > { %v4299_v24 = vadd.f32 %v3198_v23, %v3197_v22  ;;  %v3200_v25 = vpop.f32.mrb[2].mxu1  ;;  %v4307_v36 = vadd.f32 %v3150_v35, %v3149_v34  ;;  %v3152_v37 = vpop.f32.mrb[2].mxu0 }
 0x136   : > { %v3201_v26 = vpop.f32.mrb[3].mxu1  ;;  %v3153_v38 = vpop.f32.mrb[3].mxu0 }
 0x137   : > { %v4301_v27 = vadd.f32 %v3201_v26, %v3200_v25  ;;  %v4309_v40 = vadd.f32 %v3153_v38, %v3152_v37 }
 0x13b   : > { %v3203_v28 = vpop.f32.mrb[4].mxu1  ;;  %v3155_v46 = vpop.f32.mrb[4].mxu0 }
 0x13c   : > { %v3204_v29 = vpop.f32.mrb[5].mxu1  ;;  %v3156_v47 = vpop.f32.mrb[5].mxu0 }
 0x13d   : > { %v4303_v30 = vadd.f32 %v3204_v29, %v3203_v28  ;;  %v3206_v31 = vpop.f32.mrb[6].mxu1  ;;  %v4315_v48 = vadd.f32 %v3156_v47, %v3155_v46  ;;  %v3158_v49 = vpop.f32.mrb[6].mxu0 }
 0x13e   : > { %v3207_v32 = vpop.f32.mrb[7].mxu1  ;;  %v3159_v50 = vpop.f32.mrb[7].mxu0 }
 0x13f   : > { %v4305_v33 = vadd.f32 %v3207_v32, %v3206_v31  ;;  %v4317_v52 = vadd.f32 %v3159_v50, %v3158_v49 }
 0x143   : > { %v3209_v39 = vpop.f32.mrb[8].mxu1  ;;  %v3161_v58 = vpop.f32.mrb[8].mxu0 }
 0x144   : > { %v3210_v41 = vpop.f32.mrb[9].mxu1  ;;  %v3162_v59 = vpop.f32.mrb[9].mxu0 }
 0x145   : > { %v4311_v42 = vadd.f32 %v3210_v41, %v3209_v39  ;;  %v3212_v43 = vpop.f32.mrb[10].mxu1  ;;  %v4323_v60 = vadd.f32 %v3162_v59, %v3161_v58  ;;  %v3164_v61 = vpop.f32.mrb[10].mxu0 }
 0x146   : > { %v3213_v44 = vpop.f32.mrb[11].mxu1  ;;  %v3165_v62 = vpop.f32.mrb[11].mxu0 }
 0x147   : > { %v4313_v45 = vadd.f32 %v3213_v44, %v3212_v43  ;;  %v4325_v0 = vadd.f32 %v3165_v62, %v3164_v61 }
 0x14b   : > { %v3215_v51 = vpop.f32.mrb[12].mxu1  ;;  %v3167_v6 = vpop.f32.mrb[12].mxu0 }
 0x14c   : > { %v3216_v53 = vpop.f32.mrb[13].mxu1  ;;  %v3168_v7 = vpop.f32.mrb[13].mxu0 }
 0x14d   : > { %v4319_v54 = vadd.f32 %v3216_v53, %v3215_v51  ;;  %v3218_v55 = vpop.f32.mrb[14].mxu1  ;;  %v4331_v8 = vadd.f32 %v3168_v7, %v3167_v6  ;;  %v3170_v9 = vpop.f32.mrb[14].mxu0 }
 0x14e   : > { %v3219_v56 = vpop.f32.mrb[15].mxu1  ;;  %v3171_v10 = vpop.f32.mrb[15].mxu0 }
 0x14f   : > { %v4321_v57 = vadd.f32 %v3219_v56, %v3218_v55  ;;  %v4333_v12 = vadd.f32 %v3171_v10, %v3170_v9  ;;  %v484_v10 = vld [vmem:[#allocation2 + $0x8] sm:$0xff] }
 0x153   : > { %v3221_v63 = vpop.f32.mrb[16].mxu1  ;;  %v3173_v18 = vpop.f32.mrb[16].mxu0 }
 0x154   : > { %v3222_v1 = vpop.f32.mrb[17].mxu1  ;;  %v3174_v19 = vpop.f32.mrb[17].mxu0 }
 0x155   : > { %v4327_v2 = vadd.f32 %v3222_v1, %v3221_v63  ;;  %v3224_v3 = vpop.f32.mrb[18].mxu1  ;;  %v4339_v20 = vadd.f32 %v3174_v19, %v3173_v18  ;;  %v3176_v21 = vpop.f32.mrb[18].mxu0 }
 0x156   : > { %v3225_v4 = vpop.f32.mrb[19].mxu1  ;;  %v3177_v22 = vpop.f32.mrb[19].mxu0 }
 0x157   : > { %v4329_v5 = vadd.f32 %v3225_v4, %v3224_v3  ;;  %v4341_v25 = vadd.f32 %v3177_v22, %v3176_v21  ;;  %v483_v3 = vld [vmem:[#allocation2] sm:$0xff] }
 0x15b   : > { %v3227_v11 = vpop.f32.mrb[20].mxu1  ;;  %v3179_v34 = vpop.f32.mrb[20].mxu0 }
 0x15c   : > { %v3228_v13 = vpop.f32.mrb[21].mxu1  ;;  %v3180_v35 = vpop.f32.mrb[21].mxu0 }
 0x15d   : > { %v4335_v14 = vadd.f32 %v3228_v13, %v3227_v11  ;;  %v3230_v15 = vpop.f32.mrb[22].mxu1  ;;  %v4347_v37 = vadd.f32 %v3180_v35, %v3179_v34  ;;  %v3182_v38 = vpop.f32.mrb[22].mxu0  ;;  %v485_v34 = vld [vmem:[#allocation2 + $0x10] sm:$0xff] }
 0x15e   : > { %v3231_v16 = vpop.f32.mrb[23].mxu1  ;;  %v3183_v39 = vpop.f32.mrb[23].mxu0 }
 0x15f   : > { %v4337_v17 = vadd.f32 %v3231_v16, %v3230_v15  ;;  %v4349_v43 = vadd.f32 %v3183_v39, %v3182_v38  ;;  %v486_v39 = vld [vmem:[#allocation2 + $0x18] sm:$0xff] }
 0x163   : > { %v3233_v23 = vpop.f32.mrb[24].mxu1  ;;  %v3185_v51 = vpop.f32.mrb[24].mxu0 }
 0x164   : > { %v3234_v26 = vpop.f32.mrb[25].mxu1  ;;  %v3186_v53 = vpop.f32.mrb[25].mxu0 }
 0x165   : > { %v4343_v28 = vadd.f32 %v3234_v26, %v3233_v23  ;;  %v3236_v29 = vpop.f32.mrb[26].mxu1  ;;  %v4355_v55 = vadd.f32 %v3186_v53, %v3185_v51  ;;  %v3188_v56 = vpop.f32.mrb[26].mxu0 }
 0x166   : > { %v3237_v31 = vpop.f32.mrb[27].mxu1  ;;  %v3189_v58 = vpop.f32.mrb[27].mxu0 }
 0x167   : > { %v4345_v32 = vadd.f32 %v3237_v31, %v3236_v29  ;;  %v4357_v61 = vadd.f32 %v3189_v58, %v3188_v56  ;;  %v1612_v29 = vpop.permute.xlu0 %1611 }
 0x16b   : > { %v3239_v41 = vpop.f32.mrb[28].mxu1  ;;  %v3191_v9 = vpop.f32.mrb[28].mxu0 }
 0x16c   : > { %v3240_v44 = vpop.f32.mrb[29].mxu1  ;;  %v3192_v11 = vpop.f32.mrb[29].mxu0 }
 0x16d   : > { %v4351_v46 = vadd.f32 %v3240_v44, %v3239_v41  ;;  %v3242_v47 = vpop.f32.mrb[30].mxu1  ;;  %v4361_v16 = vadd.f32 %v3192_v11, %v3191_v9  ;;  %v3194_v18 = vpop.f32.mrb[30].mxu0  ;;  %v488_v9 = vld [vmem:[#allocation2 + $0x28] sm:$0xff] }
 0x16e   : > { %v3243_v49 = vpop.f32.mrb[31].mxu1  ;;  %v3195_v19 = vpop.f32.mrb[31].mxu0 }
 0x16f   : > { %v4353_v50 = vadd.f32 %v3243_v49, %v3242_v47  ;;  %v4364_v23 = vadd.f32 %v3195_v19, %v3194_v18  ;;  %v1617_v49 = vpop.permute.xlu0 %1616 }
 0x173   : > { %v3261_v59 = vpop.f32.mrb[32].mxu1 }
 0x174   : > { %v3262_v62 = vpop.f32.mrb[33].mxu1 }
 0x175   : > { %v3263_v63 = vadd.f32 %v3262_v62, %v3261_v59  ;;  %v3264_v1 = vpop.f32.mrb[34].mxu1 }
 0x176   : > { %v3265_v4 = vpop.f32.mrb[35].mxu1 }
 0x177   : > { %v1351_v6 = vadd.f32 %v3263_v63, %v4307_v36  ;;  %v3266_v7 = vadd.f32 %v3265_v4, %v3264_v1 }
 0x179   : > { %v1477_v13 = vadd.f32 %v1351_v6, %v483_v3  ;;  %v1354_v15 = vadd.f32 %v3266_v7, %v4309_v40  ;;  %v1622_v3 = vpop.permute.xlu1 %1621 }
 0x17b   : > { %1510 = vst.msk [vmem:[#allocation2] sm:$0xff] %vm450_vm1, %v1477_v13  ;;  %v1478_v21 = vadd.f32 %v1354_v15, %v484_v10  ;;  %v3267_v22 = vpop.f32.mrb[36].mxu1 }
 0x17c   : > { %v3268_v26 = vpop.f32.mrb[37].mxu1 }
 0x17d   : > { %1511 = vst.msk [vmem:[#allocation2 + $0x8] sm:$0xff] %vm450_vm1, %v1478_v21  ;;  %v3269_v36 = vadd.f32 %v3268_v26, %v3267_v22  ;;  %v3270_v31 = vpop.f32.mrb[38].mxu1  ;;  %v1627_v19 = vpop.permute.xlu1 %1626 }
 0x17e   : > { %v3271_v35 = vpop.f32.mrb[39].mxu1 }
 0x17f   : > { %v1359_v40 = vadd.f32 %v3269_v36, %v4315_v48  ;;  %v3272_v38 = vadd.f32 %v3271_v35, %v3270_v31  ;;  %v487_v48 = vld [vmem:[#allocation2 + $0x20] sm:$0xff]  ;;  %v489_v31 = vld [vmem:[#allocation2 + $0x30] sm:$0xff] }
 0x181   : > { %v1479_v41 = vadd.f32 %v1359_v40, %v485_v34  ;;  %v1362_v44 = vadd.f32 %v3272_v38, %v4317_v52  ;;  %v490_v38 = vld [vmem:[#allocation2 + $0x38] sm:$0xff] }
 0x182   : > { %v1545_v47 = vld [vmem:[#allocation2] sm:$0xff] }
 0x183   : > { %1512 = vst.msk [vmem:[#allocation2 + $0x10] sm:$0xff] %vm450_vm1, %v1479_v41  ;;  %v1480_v51 = vadd.f32 %v1362_v44, %v486_v39  ;;  %v3273_v53 = vpop.f32.mrb[40].mxu1  ;;  %v1769_v59 = vmul.f32 %v1612_v29, %v1545_v47  ;;  %v1632_v47 = vpop.permute.xlu0 %1631 }
 0x184   : > { %v1546_v56 = vld [vmem:[#allocation2 + $0x8] sm:$0xff]  ;;  %v3274_v58 = vpop.f32.mrb[41].mxu1 }
 0x185   : > { %1513 = vst.msk [vmem:[#allocation2 + $0x18] sm:$0xff] %vm450_vm1, %v1480_v51  ;;  %v1770_v62 = vmul.f32 %v1617_v49, %v1546_v56  ;;  %v3275_v63 = vadd.f32 %v3274_v58, %v3273_v53  ;;  %v3276_v1 = vpop.f32.mrb[42].mxu1  ;;  %v1637_v53 = vpop.permute.xlu1 %1636 }
 0x186   : > { %v3277_v4 = vpop.f32.mrb[43].mxu1 }
 0x187   : > { %v1801_v6 = vpack.c.bf16 %v1770_v62, %v1769_v59  ;;  %v1367_v52 = vadd.f32 %v3275_v63, %v4323_v60  ;;  %v3278_v7 = vadd.f32 %v3277_v4, %v3276_v1  ;;  %v491_v1 = vld [vmem:[#allocation2 + $0x40] sm:$0xff] }
 0x189   : > { %v1481_v10 = vadd.f32 %v1367_v52, %v487_v48  ;;  %v1370_v11 = vadd.f32 %v3278_v7, %v4325_v0  ;;  %3427 = vmatprep.mubr.msk.bf16.mxu0 %vm450_vm1, %v1801_v6  ;;  %v492_v6 = vld [vmem:[#allocation2 + $0x48] sm:$0xff] }
 0x18a   : > { %v1547_v13 = vld [vmem:[#allocation2 + $0x10] sm:$0xff] }
 0x18b   : > { %1514 = vst.msk [vmem:[#allocation2 + $0x20] sm:$0xff] %vm450_vm1, %v1481_v10  ;;  %v1482_v15 = vadd.f32 %v1370_v11, %v488_v9  ;;  %v3279_v18 = vpop.f32.mrb[44].mxu1  ;;  %v1771_v26 = vmul.f32 %v1622_v3, %v1547_v13  ;;  %v1642_v10 = vpop.permute.xlu0 %1641 }
 0x18c   : > { %v1548_v21 = vld [vmem:[#allocation2 + $0x18] sm:$0xff]  ;;  %v3280_v22 = vpop.f32.mrb[45].mxu1 }
 0x18d   : > { %1515 = vst.msk [vmem:[#allocation2 + $0x28] sm:$0xff] %vm450_vm1, %v1482_v15  ;;  %v1772_v29 = vmul.f32 %v1627_v19, %v1548_v21  ;;  %v3281_v60 = vadd.f32 %v3280_v22, %v3279_v18  ;;  %v3282_v36 = vpop.f32.mrb[46].mxu1  ;;  %v1647_v15 = vpop.permute.xlu1 %1646 }
 0x18e   : > { %v3283_v34 = vpop.f32.mrb[47].mxu1 }
 0x18f   : > { %v1802_v35 = vpack.c.bf16 %v1772_v29, %v1771_v26  ;;  %v1375_v0 = vadd.f32 %v3281_v60, %v4331_v8  ;;  %v3284_v40 = vadd.f32 %v3283_v34, %v3282_v36  ;;  %v493_v29 = vld [vmem:[#allocation2 + $0x50] sm:$0xff]  ;;  %v494_v34 = vld [vmem:[#allocation2 + $0x58] sm:$0xff] }
 0x191   : > { %v1483_v39 = vadd.f32 %v1375_v0, %v489_v31  ;;  %v1378_v41 = vadd.f32 %v3284_v40, %v4333_v12  ;;  %3428 = vmatmul.mubr.msk.bf16.vlgmr.msra.gmra.mrb[32].mxu0 %vm450_vm1, %v1802_v35 }
 0x192   : > { %v1549_v44 = vld [vmem:[#allocation2 + $0x20] sm:$0xff] }
 0x193   : > { %1516 = vst.msk [vmem:[#allocation2 + $0x30] sm:$0xff] %vm450_vm1, %v1483_v39  ;;  %v1484_v49 = vadd.f32 %v1378_v41, %v490_v38  ;;  %v3285_v51 = vpop.f32.mrb[48].mxu1  ;;  %v1773_v59 = vmul.f32 %v1632_v47, %v1549_v44  ;;  %v1652_v38 = vpop.permute.xlu0 %1651 }
 0x194   : > { %v1550_v56 = vld [vmem:[#allocation2 + $0x28] sm:$0xff]  ;;  %v3286_v58 = vpop.f32.mrb[49].mxu1  ;;  %v1657_v44 = vpop.permute.xlu1 %1656 }
 0x195   : > { %v1774_v62 = vmul.f32 %v1637_v53, %v1550_v56  ;;  %1517 = vst.msk [vmem:[#allocation2 + $0x38] sm:$0xff] %vm450_vm1, %v1484_v49  ;;  %v3287_v8 = vadd.f32 %v3286_v58, %v3285_v51  ;;  %v3288_v63 = vpop.f32.mrb[50].mxu1  ;;  %v495_v58 = vld [vmem:[#allocation2 + $0x60] sm:$0xff] }
 0x196   : > { %v3289_v48 = vpop.f32.mrb[51].mxu1 }
 0x197   : > { %v1803_v12 = vpack.c.bf16 %v1774_v62, %v1773_v59  ;;  %v1383_v3 = vadd.f32 %v3287_v8, %v4339_v20  ;;  %v3290_v4 = vadd.f32 %v3289_v48, %v3288_v63  ;;  %v496_v63 = vld [vmem:[#allocation2 + $0x68] sm:$0xff] }
 0x199   : > { %v1485_v52 = vadd.f32 %v1383_v3, %v491_v1  ;;  %v1386_v7 = vadd.f32 %v3290_v4, %v4341_v25  ;;  %3431 = vmatprep.mubr.msk.bf16.mxu0 %vm450_vm1, %v1803_v12  ;;  %v1662_v3 = vpop.permute.xlu0 %1661 }
 0x19a   : > { %v1551_v9 = vld [vmem:[#allocation2 + $0x30] sm:$0xff] }
 0x19b   : > { %1518 = vst.msk [vmem:[#allocation2 + $0x40] sm:$0xff] %vm450_vm1, %v1485_v52  ;;  %v1486_v11 = vadd.f32 %v1386_v7, %v492_v6  ;;  %v3291_v13 = vpop.f32.mrb[52].mxu1  ;;  %v1775_v21 = vmul.f32 %v1642_v10, %v1551_v9  ;;  %v1667_v52 = vpop.permute.xlu1 %1666 }
 0x19c   : > { %v1552_v18 = vld [vmem:[#allocation2 + $0x38] sm:$0xff]  ;;  %v3292_v19 = vpop.f32.mrb[53].mxu1 }
 0x19d   : > { %v1776_v22 = vmul.f32 %v1647_v15, %v1552_v18  ;;  %1519 = vst.msk [vmem:[#allocation2 + $0x48] sm:$0xff] %vm450_vm1, %v1486_v11  ;;  %v3293_v20 = vadd.f32 %v3292_v19, %v3291_v13  ;;  %v3294_v26 = vpop.f32.mrb[54].mxu1  ;;  %v497_v15 = vld [vmem:[#allocation2 + $0x70] sm:$0xff] }
 0x19e   : > { %v3295_v60 = vpop.f32.mrb[55].mxu1 }
 0x19f   : > { %v1804_v25 = vpack.c.bf16 %v1776_v22, %v1775_v21  ;;  %v1391_v36 = vadd.f32 %v3293_v20, %v4347_v37  ;;  %v3296_v31 = vadd.f32 %v3295_v60, %v3294_v26  ;;  %v498_v22 = vld [vmem:[#allocation2 + $0x78] sm:$0xff]  ;;  %v1672_v60 = vpop.permute.xlu0 %1671 }
 0x1a1   : > { %v1487_v35 = vadd.f32 %v1391_v36, %v493_v29  ;;  %v1394_v0 = vadd.f32 %v3296_v31, %v4349_v43  ;;  %3432 = vmatmul.mubr.msk.bf16.gmra.mrb[36].mxu0 %vm450_vm1, %v1804_v25  ;;  %v1677_v31 = vpop.permute.xlu1 %1676 }
 0x1a2   : > { %v1553_v40 = vld [vmem:[#allocation2 + $0x40] sm:$0xff] }
 0x1a3   : > { %1520 = vst.msk [vmem:[#allocation2 + $0x50] sm:$0xff] %vm450_vm1, %v1487_v35  ;;  %v1488_v39 = vadd.f32 %v1394_v0, %v494_v34  ;;  %v3297_v41 = vpop.f32.mrb[56].mxu1  ;;  %v1777_v53 = vmul.f32 %v1652_v38, %v1553_v40 }
 0x1a4   : > { %v3298_v47 = vpop.f32.mrb[57].mxu1  ;;  %v1554_v49 = vld [vmem:[#allocation2 + $0x48] sm:$0xff] }
 0x1a5   : > { %1521 = vst.msk [vmem:[#allocation2 + $0x58] sm:$0xff] %vm450_vm1, %v1488_v39  ;;  %v3299_v51 = vadd.f32 %v3298_v47, %v3297_v41  ;;  %v3300_v37 = vpop.f32.mrb[58].mxu1  ;;  %v1778_v56 = vmul.f32 %v1657_v44, %v1554_v49  ;;  %v499_v39 = vld [vmem:[#allocation2 + $0x80] sm:$0xff]  ;;  %v500_v49 = vld [vmem:[#allocation2 + $0x88] sm:$0xff] }
 0x1a6   : > { %v3301_v59 = vpop.f32.mrb[59].mxu1 }
 0x1a7   : > { %v1399_v43 = vadd.f32 %v3299_v51, %v4355_v55  ;;  %v3302_v62 = vadd.f32 %v3301_v59, %v3300_v37  ;;  %v1805_v8 = vpack.c.bf16 %v1778_v56, %v1777_v53  ;;  %v1682_v56 = vpop.permute.xlu0 %1681 }
 0x1a9   : > { %v1489_v1 = vadd.f32 %v1399_v43, %v495_v58  ;;  %v1402_v48 = vadd.f32 %v3302_v62, %v4357_v61  ;;  %3435 = vmatprep.mubr.msk.bf16.mxu0 %vm450_vm1, %v1805_v8  ;;  %v1687_v43 = vpop.permute.xlu1 %1686 }
 0x1aa   : > { %v1555_v12 = vld [vmem:[#allocation2 + $0x50] sm:$0xff] }
 0x1ab   : > { %1522 = vst.msk [vmem:[#allocation2 + $0x60] sm:$0xff] %vm450_vm1, %v1489_v1  ;;  %v1490_v4 = vadd.f32 %v1402_v48, %v496_v63  ;;  %v3303_v6 = vpop.f32.mrb[60].mxu1  ;;  %v1779_v11 = vmul.f32 %v1662_v3, %v1555_v12  ;;  %v501_v12 = vld [vmem:[#allocation2 + $0x90] sm:$0xff] }
 0x1ac   : > { %v3304_v7 = vpop.f32.mrb[61].mxu1  ;;  %v1556_v9 = vld [vmem:[#allocation2 + $0x58] sm:$0xff] }
 0x1ad   : > { %1523 = vst.msk [vmem:[#allocation2 + $0x68] sm:$0xff] %vm450_vm1, %v1490_v4  ;;  %v3305_v55 = vadd.f32 %v3304_v7, %v3303_v6  ;;  %v3306_v10 = vpop.f32.mrb[62].mxu1  ;;  %v1780_v13 = vmul.f32 %v1667_v52, %v1556_v9  ;;  %v502_v52 = vld [vmem:[#allocation2 + $0x98] sm:$0xff] }
 0x1ae   : > { %v3307_v18 = vpop.f32.mrb[63].mxu1 }
 0x1af   : > { %v1407_v61 = vadd.f32 %v3305_v55, %v4361_v16  ;;  %v3308_v19 = vadd.f32 %v3307_v18, %v3306_v10  ;;  %v1806_v21 = vpack.c.bf16 %v1780_v13, %v1779_v11  ;;  %v1692_v10 = vpop.permute.xlu0 %1691 }
 0x1b1   : > { %v1491_v20 = vadd.f32 %v1407_v61, %v497_v15  ;;  %v1410_v26 = vadd.f32 %v3308_v19, %v4364_v23  ;;  %3436 = vmatmul.mubr.msk.bf16.gmra.mrb[40].mxu0 %vm450_vm1, %v1806_v21  ;;  %v1697_v15 = vpop.permute.xlu1 %1696 }
 0x1b2   : > { %v1557_v29 = vld [vmem:[#allocation2 + $0x60] sm:$0xff] }
 0x1b3   : > { %1524 = vst.msk [vmem:[#allocation2 + $0x70] sm:$0xff] %vm450_vm1, %v1491_v20  ;;  %v1492_v25 = vadd.f32 %v1410_v26, %v498_v22  ;;  %v3309_v36 = vpop.f32.mrb[64].mxu1  ;;  %v1781_v40 = vmul.f32 %v1672_v60, %v1557_v29  ;;  %v503_v20 = vld [vmem:[#allocation2 + $0xa0] sm:$0xff] }
 0x1b4   : > { %v3310_v34 = vpop.f32.mrb[65].mxu1  ;;  %v1558_v35 = vld [vmem:[#allocation2 + $0x68] sm:$0xff] }
 0x1b5   : > { %1525 = vst.msk [vmem:[#allocation2 + $0x78] sm:$0xff] %vm450_vm1, %v1492_v25  ;;  %v3311_v16 = vadd.f32 %v3310_v34, %v3309_v36  ;;  %v3312_v0 = vpop.f32.mrb[66].mxu1  ;;  %v1782_v38 = vmul.f32 %v1677_v31, %v1558_v35  ;;  %v504_v25 = vld [vmem:[#allocation2 + $0xa8] sm:$0xff]  ;;  %v1702_v35 = vpop.permute.xlu0 %1701 }
 0x1b6   : > { %v3313_v41 = vpop.f32.mrb[67].mxu1 }
 0x1b7   : > { %v1415_v23 = vadd.f32 %v3311_v16, %v4299_v24  ;;  %v3314_v44 = vadd.f32 %v3313_v41, %v3312_v0  ;;  %v1807_v47 = vpack.c.bf16 %v1782_v38, %v1781_v40  ;;  %v1707_v40 = vpop.permute.xlu1 %1706 }
 0x1b9   : > { %v1493_v51 = vadd.f32 %v1415_v23, %v499_v39  ;;  %v1418_v37 = vadd.f32 %v3314_v44, %v4301_v27  ;;  %3439 = vmatprep.mubr.msk.bf16.mxu0 %vm450_vm1, %v1807_v47  ;;  %v505_v47 = vld [vmem:[#allocation2 + $0xb0] sm:$0xff] }
 0x1ba   : > { %v1559_v53 = vld [vmem:[#allocation2 + $0x70] sm:$0xff] }
 0x1bb   : > { %1526 = vst.msk [vmem:[#allocation2 + $0x80] sm:$0xff] %vm450_vm1, %v1493_v51  ;;  %v1494_v58 = vadd.f32 %v1418_v37, %v500_v49  ;;  %v3315_v59 = vpop.f32.mrb[68].mxu1  ;;  %v1783_v1 = vmul.f32 %v1682_v56, %v1559_v53  ;;  %v506_v53 = vld [vmem:[#allocation2 + $0xb8] sm:$0xff] }
 0x1bc   : > { %v3316_v62 = vpop.f32.mrb[69].mxu1  ;;  %v1560_v8 = vld [vmem:[#allocation2 + $0x78] sm:$0xff] }
 0x1bd   : > { %1527 = vst.msk [vmem:[#allocation2 + $0x88] sm:$0xff] %vm450_vm1, %v1494_v58  ;;  %v3317_v24 = vadd.f32 %v3316_v62, %v3315_v59  ;;  %v3318_v63 = vpop.f32.mrb[70].mxu1  ;;  %v1784_v48 = vmul.f32 %v1687_v43, %v1560_v8  ;;  %v1712_v43 = vpop.permute.xlu0 %1711 }
 0x1be   : > { %v3319_v3 = vpop.f32.mrb[71].mxu1 }
 0x1bf   : > { %v1423_v27 = vadd.f32 %v3317_v24, %v4303_v30  ;;  %v3320_v4 = vadd.f32 %v3319_v3, %v3318_v63  ;;  %v1808_v6 = vpack.c.bf16 %v1784_v48, %v1783_v1  ;;  %v1717_v24 = vpop.permute.xlu1 %1716 }
 0x1c1   : > { %v1495_v7 = vadd.f32 %v1423_v27, %v501_v12  ;;  %v1426_v9 = vadd.f32 %v3320_v4, %v4305_v33  ;;  %3440 = vmatmul.mubr.msk.bf16.gmra.mrb[44].mxu0 %vm450_vm1, %v1808_v6  ;;  %v507_v27 = vld [vmem:[#allocation2 + $0xc0] sm:$0xff] }
 0x1c2   : > { %v1561_v55 = vld [vmem:[#allocation2 + $0x80] sm:$0xff] }
 0x1c3   : > { %1528 = vst.msk [vmem:[#allocation2 + $0x90] sm:$0xff] %vm450_vm1, %v1495_v7  ;;  %v1496_v11 = vadd.f32 %v1426_v9, %v502_v52  ;;  %v3321_v13 = vpop.f32.mrb[72].mxu1  ;;  %v1785_v21 = vmul.f32 %v1692_v10, %v1561_v55  ;;  %v508_v7 = vld [vmem:[#allocation2 + $0xc8] sm:$0xff] }
 0x1c4   : > { %v3322_v18 = vpop.f32.mrb[73].mxu1  ;;  %v1562_v61 = vld [vmem:[#allocation2 + $0x88] sm:$0xff] }
 0x1c5   : > { %1529 = vst.msk [vmem:[#allocation2 + $0x98] sm:$0xff] %vm450_vm1, %v1496_v11  ;;  %v3323_v30 = vadd.f32 %v3322_v18, %v3321_v13  ;;  %v3324_v19 = vpop.f32.mrb[74].mxu1  ;;  %v1786_v22 = vmul.f32 %v1697_v15, %v1562_v61  ;;  %v1722_v11 = vpop.permute.xlu0 %1721 }
 0x1c6   : > { %v3325_v26 = vpop.f32.mrb[75].mxu1  ;;  %v1727_v18 = vpop.permute.xlu1 %1726 }
 0x1c7   : > { %v1431_v33 = vadd.f32 %v3323_v30, %v4311_v42  ;;  %v3326_v29 = vadd.f32 %v3325_v26, %v3324_v19  ;;  %v1809_v60 = vpack.c.bf16 %v1786_v22, %v1785_v21 }
 0x1c9   : > { %v1497_v36 = vadd.f32 %v1431_v33, %v503_v20  ;;  %v1434_v31 = vadd.f32 %v3326_v29, %v4313_v45  ;;  %3443 = vmatprep.mubr.msk.bf16.mxu0 %vm450_vm1, %v1809_v60  ;;  %v509_v20 = vld [vmem:[#allocation2 + $0xd0] sm:$0xff]  ;;  %v510_v60 = vld [vmem:[#allocation2 + $0xd8] sm:$0xff] }
 0x1ca   : > { %v1563_v34 = vld [vmem:[#allocation2 + $0x90] sm:$0xff] }
 0x1cb   : > { %1530 = vst.msk [vmem:[#allocation2 + $0xa0] sm:$0xff] %vm450_vm1, %v1497_v36  ;;  %v1498_v16 = vadd.f32 %v1434_v31, %v504_v25  ;;  %v3327_v0 = vpop.f32.mrb[76].mxu1  ;;  %v1787_v23 = vmul.f32 %v1702_v35, %v1563_v34  ;;  %v1732_v34 = vpop.permute.xlu0 %1731 }
 0x1cc   : > { %v3328_v38 = vpop.f32.mrb[77].mxu1  ;;  %v1564_v39 = vld [vmem:[#allocation2 + $0x98] sm:$0xff] }
 0x1cd   : > { %1531 = vst.msk [vmem:[#allocation2 + $0xa8] sm:$0xff] %vm450_vm1, %v1498_v16  ;;  %v3329_v42 = vadd.f32 %v3328_v38, %v3327_v0  ;;  %v3330_v41 = vpop.f32.mrb[78].mxu1  ;;  %v1788_v44 = vmul.f32 %v1707_v40, %v1564_v39  ;;  %v1737_v0 = vpop.permute.xlu1 %1736 }
 0x1ce   : > { %v3331_v49 = vpop.f32.mrb[79].mxu1 }
 0x1cf   : > { %v1439_v45 = vadd.f32 %v3329_v42, %v4319_v54  ;;  %v3332_v51 = vadd.f32 %v3331_v49, %v3330_v41  ;;  %v1810_v37 = vpack.c.bf16 %v1788_v44, %v1787_v23  ;;  %v511_v23 = vld [vmem:[#allocation2 + $0xe0] sm:$0xff] }
 0x1d1   : > { %v1499_v56 = vadd.f32 %v1439_v45, %v505_v47  ;;  %v1442_v58 = vadd.f32 %v3332_v51, %v4321_v57  ;;  %3444 = vmatmul.mubr.msk.bf16.gmra.mrb[48].mxu0 %vm450_vm1, %v1810_v37  ;;  %v512_v45 = vld [vmem:[#allocation2 + $0xe8] sm:$0xff] }
 0x1d2   : > { %v1565_v59 = vld [vmem:[#allocation2 + $0xa0] sm:$0xff] }
 0x1d3   : > { %1532 = vst.msk [vmem:[#allocation2 + $0xb0] sm:$0xff] %vm450_vm1, %v1499_v56  ;;  %v1500_v62 = vadd.f32 %v1442_v58, %v506_v53  ;;  %v3333_v8 = vpop.f32.mrb[80].mxu1  ;;  %v1789_v12 = vmul.f32 %v1712_v43, %v1565_v59  ;;  %v1742_v56 = vpop.permute.xlu0 %1741 }
 0x1d4   : > { %v3334_v63 = vpop.f32.mrb[81].mxu1  ;;  %v1566_v1 = vld [vmem:[#allocation2 + $0xa8] sm:$0xff]  ;;  %v1747_v43 = vpop.permute.xlu1 %1746 }
 0x1d5   : > { %1533 = vst.msk [vmem:[#allocation2 + $0xb8] sm:$0xff] %vm450_vm1, %v1500_v62  ;;  %v3335_v54 = vadd.f32 %v3334_v63, %v3333_v8  ;;  %v3336_v48 = vpop.f32.mrb[82].mxu1  ;;  %v1790_v3 = vmul.f32 %v1717_v24, %v1566_v1 }
 0x1d6   : > { %v3337_v4 = vpop.f32.mrb[83].mxu1 }
 0x1d7   : > { %v1447_v57 = vadd.f32 %v3335_v54, %v4327_v2  ;;  %v3338_v6 = vadd.f32 %v3337_v4, %v3336_v48  ;;  %v1811_v52 = vpack.c.bf16 %v1790_v3, %v1789_v12  ;;  %v513_v54 = vld [vmem:[#allocation2 + $0xf0] sm:$0xff] }
 0x1d9   : > { %v1501_v9 = vadd.f32 %v1447_v57, %v507_v27  ;;  %v1450_v55 = vadd.f32 %v3338_v6, %v4329_v5  ;;  %3447 = vmatprep.mubr.msk.bf16.mxu0 %vm450_vm1, %v1811_v52  ;;  %v514_v27 = vld [vmem:[#allocation2 + $0xf8] sm:$0xff] }
 0x1da   : > { %v1567_v10 = vld [vmem:[#allocation2 + $0xb0] sm:$0xff] }
 0x1db   : > { %1534 = vst.msk [vmem:[#allocation2 + $0xc0] sm:$0xff] %vm450_vm1, %v1501_v9  ;;  %v1502_v13 = vadd.f32 %v1450_v55, %v508_v7  ;;  %v3339_v15 = vpop.f32.mrb[84].mxu1  ;;  %v1791_v21 = vmul.f32 %v1722_v11, %v1567_v10  ;;  %v1752_v7 = vpop.permute.xlu0 %1751 }
 0x1dc   : > { %v3340_v61 = vpop.f32.mrb[85].mxu1  ;;  %v1568_v30 = vld [vmem:[#allocation2 + $0xb8] sm:$0xff]  ;;  %v1757_v9 = vpop.permute.xlu1 %1756 }
 0x1dd   : > { %1535 = vst.msk [vmem:[#allocation2 + $0xc8] sm:$0xff] %vm450_vm1, %v1502_v13  ;;  %v3341_v2 = vadd.f32 %v3340_v61, %v3339_v15  ;;  %v3342_v19 = vpop.f32.mrb[86].mxu1  ;;  %v1792_v22 = vmul.f32 %v1727_v18, %v1568_v30 }
 0x1de   : > { %v3343_v26 = vpop.f32.mrb[87].mxu1 }
 0x1df   : > { %v1455_v5 = vadd.f32 %v3341_v2, %v4335_v14  ;;  %v3344_v33 = vadd.f32 %v3343_v26, %v3342_v19  ;;  %v1812_v29 = vpack.c.bf16 %v1792_v22, %v1791_v21  ;;  %v1762_v15 = vpop.permute.xlu0 %1761  ;;  %v4446_v19 = vld [vmem:[%s4593_s6] ss:$0 sm:$0xff] }
 0x1e1   : > { %v1503_v25 = vadd.f32 %v1455_v5, %v509_v20  ;;  %v1458_v36 = vadd.f32 %v3344_v33, %v4337_v17  ;;  %3448 = vmatmul.mubr.msk.bf16.gmra.mrb[52].mxu0 %vm450_vm1, %v1812_v29 }
 0x1e2   : > { %v1569_v31 = vld [vmem:[#allocation2 + $0xc0] sm:$0xff] }
 0x1e3   : > { %1536 = vst.msk [vmem:[#allocation2 + $0xd0] sm:$0xff] %vm450_vm1, %v1503_v25  ;;  %v1504_v35 = vadd.f32 %v1458_v36, %v510_v60  ;;  %v3345_v16 = vpop.f32.mrb[88].mxu1  ;;  %v1793_v42 = vmul.f32 %v1732_v34, %v1569_v31  ;;  %v2429_v25 = vld [vmem:[%s4006_s24 + $0x10] sm:$0xff]  ;;  %v2430_v31 = vld [vmem:[%s4006_s24 + $0x18] sm:$0xff] }
 0x1e4   : > { %v3346_v40 = vpop.f32.mrb[89].mxu1  ;;  %v1570_v38 = vld [vmem:[#allocation2 + $0xc8] sm:$0xff] }
 0x1e5   : > { %1537 = vst.msk [vmem:[#allocation2 + $0xd8] sm:$0xff] %vm450_vm1, %v1504_v35  ;;  %v3347_v14 = vadd.f32 %v3346_v40, %v3345_v16  ;;  %v3348_v39 = vpop.f32.mrb[90].mxu1  ;;  %v1794_v41 = vmul.f32 %v1737_v0, %v1570_v38  ;;  %v2427_v35 = vld [vmem:[%s4006_s24] sm:$0xff]  ;;  %v2428_v0 = vld [vmem:[%s4006_s24 + $0x8] sm:$0xff] }
 0x1e6   : > { %v3349_v44 = vpop.f32.mrb[91].mxu1 }
 0x1e7   : > { %v1463_v17 = vadd.f32 %v3347_v14, %v4343_v28  ;;  %v3350_v47 = vadd.f32 %v3349_v44, %v3348_v39  ;;  %v1813_v49 = vpack.c.bf16 %v1794_v41, %v1793_v42 }
 0x1e9   : > { %v1505_v51 = vadd.f32 %v1463_v17, %v511_v23  ;;  %v1466_v37 = vadd.f32 %v3350_v47, %v4345_v32  ;;  %3451 = vmatprep.mubr.msk.bf16.mxu0 %vm450_vm1, %v1813_v49 }
 0x1ea   : > { %v1571_v53 = vld [vmem:[#allocation2 + $0xd0] sm:$0xff] }
 0x1eb   : > { %1538 = vst.msk [vmem:[#allocation2 + $0xe0] sm:$0xff] %vm450_vm1, %v1505_v51  ;;  %v1506_v58 = vadd.f32 %v1466_v37, %v512_v45  ;;  %v3351_v59 = vpop.f32.mrb[92].mxu1  ;;  %v1795_v63 = vmul.f32 %v1742_v56, %v1571_v53  ;;  %v2433_v56 = vld [vmem:[%s4006_s24 + $0x30] sm:$0xff] }
 0x1ec   : > { %v3352_v62 = vpop.f32.mrb[93].mxu1  ;;  %v1572_v8 = vld [vmem:[#allocation2 + $0xd8] sm:$0xff] }
 0x1ed   : > { %1539 = vst.msk [vmem:[#allocation2 + $0xe8] sm:$0xff] %vm450_vm1, %v1506_v58  ;;  %v3353_v28 = vadd.f32 %v3352_v62, %v3351_v59  ;;  %v3354_v24 = vpop.f32.mrb[94].mxu1  ;;  %v1796_v1 = vmul.f32 %v1747_v43, %v1572_v8  ;;  %v2434_v59 = vld [vmem:[%s4006_s24 + $0x38] sm:$0xff]  ;;  %v2431_v62 = vld [vmem:[%s4006_s24 + $0x20] sm:$0xff] }
 0x1ee   : > { %v3355_v48 = vpop.f32.mrb[95].mxu1 }
 0x1ef   : > { %v1471_v32 = vadd.f32 %v3353_v28, %v4351_v46  ;;  %v3356_v12 = vadd.f32 %v3355_v48, %v3354_v24  ;;  %v1814_v3 = vpack.c.bf16 %v1796_v1, %v1795_v63  ;;  %v2432_v28 = vld [vmem:[%s4006_s24 + $0x28] sm:$0xff] }
 0x1f1   : > { %v1507_v4 = vadd.f32 %v1471_v32, %v513_v54  ;;  %v1474_v57 = vadd.f32 %v3356_v12, %v4353_v50  ;;  %3452 = vmatmul.mubr.msk.bf16.gmra.mrb[56].mxu0 %vm450_vm1, %v1814_v3  ;;  %v1767_v50 = vpop.permute.xlu1 %1766 }
 0x1f2   : > { %v1573_v6 = vld [vmem:[#allocation2 + $0xe0] sm:$0xff] }
 0x1f3   : > { %1540 = vst.msk [vmem:[#allocation2 + $0xf0] sm:$0xff] %vm450_vm1, %v1507_v4  ;;  %v1508_v52 = vadd.f32 %v1474_v57, %v514_v27  ;;  %v1797_v10 = vmul.f32 %v1752_v7, %v1573_v6 }
 0x1f4   : > { %v1574_v55 = vld [vmem:[#allocation2 + $0xe8] sm:$0xff] }
 0x1f5   : > { %1541 = vst.msk [vmem:[#allocation2 + $0xf8] sm:$0xff] %vm450_vm1, %v1508_v52  ;;  %v1798_v11 = vmul.f32 %v1757_v9, %v1574_v55  ;;  %v2437_v55 = vld [vmem:[%s4006_s24 + $0x50] sm:$0xff] }
 0x1f7   : > { %v1815_v46 = vpack.c.bf16 %v1798_v11, %v1797_v10  ;;  %v2438_v11 = vld [vmem:[%s4006_s24 + $0x58] sm:$0xff] }
 0x1f9   : > { %3455 = vmatprep.mubr.msk.bf16.mxu0 %vm450_vm1, %v1815_v46 }
 0x1fa   : > { %v1575_v13 = vld [vmem:[#allocation2 + $0xf0] sm:$0xff] }
 0x1fb   : > { %v1799_v61 = vmul.f32 %v1762_v15, %v1575_v13  ;;  %v2435_v13 = vld [vmem:[%s4006_s24 + $0x40] sm:$0xff] }
 0x1fc   : > { %v1576_v18 = vld [vmem:[#allocation2 + $0xf8] sm:$0xff] }
 0x1fd   : > { %v1800_v30 = vmul.f32 %v1767_v50, %v1576_v18  ;;  %v2436_v50 = vld [vmem:[%s4006_s24 + $0x48] sm:$0xff] }
 0x1ff   : > { %v1816_v2 = vpack.c.bf16 %v1800_v30, %v1799_v61 }
 0x201   : > { %3456 = vmatmul.mubr.msk.bf16.gmra.mrb[60].mxu0 %vm450_vm1, %v1816_v2 }
 0x264   : > { %v3429_v21 = vpop.f32.mrb[32].mxu0 }
 0x265   : > { %v2365_v22 = vadd.f32 %v3429_v21, %v4446_v19  ;;  %v2229_v20 = vpop.f32.mrb[33].mxu0 }
 0x266   : > { %v2363_v26 = vadd.f32 %v4446_v19, %v2229_v20  ;;  %v3430_v5 = vpop.f32.mrb[34].mxu0 }
 0x267   : > { %v2397_v33 = vmax.f32 %v2365_v22, 0.0  ;;  %v2366_v29 = vadd.f32 %v3430_v5, %v4446_v19  ;;  %v2232_v60 = vpop.f32.mrb[35].mxu0 }
 0x268   : > { %v2395_v36 = vmax.f32 %v2363_v26, 0.0  ;;  %v2364_v34 = vadd.f32 %v4446_v19, %v2232_v60 }
 0x269   : > { %v2398_v16 = vmax.f32 %v2366_v29, 0.0  ;;  %v2461_v38 = vmul.f32 %v2429_v25, %v2397_v33 }
 0x26a   : > { %v2396_v40 = vmax.f32 %v2364_v34, 0.0  ;;  %v2459_v39 = vmul.f32 %v2427_v35, %v2395_v36  ;;  %v2441_v34 = vld [vmem:[%s4006_s24 + $0x70] sm:$0xff] }
 0x26b   : > { %v2462_v14 = vmul.f32 %v2430_v31, %v2398_v16  ;;  %v2442_v16 = vld [vmem:[%s4006_s24 + $0x78] sm:$0xff] }
 0x26c   : > { %v2460_v42 = vmul.f32 %v2428_v0, %v2396_v40  ;;  %v2439_v40 = vld [vmem:[%s4006_s24 + $0x60] sm:$0xff] }
 0x26d   : > { %v3046_v41 = vpack.c.bf16 %v2462_v14, %v2461_v38  ;;  %v2440_v14 = vld [vmem:[%s4006_s24 + $0x68] sm:$0xff] }
 0x26e   : > { %v3041_v23 = vpack.c.bf16 %v2460_v42, %v2459_v39 }
 0x26f   : > { %3118 = vst [vmem:[%s4457_s26 + $0x8] sm:$0xff] %v3046_v41  }
 0x270   : > { %3042 = vst [vmem:[%s4457_s26] sm:$0xff] %v3041_v23  }
 0x274   : > { %v3433_v44 = vpop.f32.mrb[36].mxu0 }
 0x275   : > { %v2369_v17 = vadd.f32 %v3433_v44, %v4446_v19  ;;  %v2245_v47 = vpop.f32.mrb[37].mxu0 }
 0x276   : > { %v2367_v49 = vadd.f32 %v4446_v19, %v2245_v47  ;;  %v3434_v45 = vpop.f32.mrb[38].mxu0 }
 0x277   : > { %v2401_v51 = vmax.f32 %v2369_v17, 0.0  ;;  %v2370_v37 = vadd.f32 %v3434_v45, %v4446_v19  ;;  %v2248_v53 = vpop.f32.mrb[39].mxu0 }
 0x278   : > { %v2399_v58 = vmax.f32 %v2367_v49, 0.0  ;;  %v2368_v43 = vadd.f32 %v4446_v19, %v2248_v53 }
 0x279   : > { %v2402_v8 = vmax.f32 %v2370_v37, 0.0  ;;  %v2465_v63 = vmul.f32 %v2433_v56, %v2401_v51 }
 0x27a   : > { %v2400_v24 = vmax.f32 %v2368_v43, 0.0  ;;  %v2463_v54 = vmul.f32 %v2431_v62, %v2399_v58  ;;  %v2445_v43 = vld [vmem:[%s4006_s24 + $0x90] sm:$0xff] }
 0x27b   : > { %v2466_v1 = vmul.f32 %v2434_v59, %v2402_v8  ;;  %v2446_v8 = vld [vmem:[%s4006_s24 + $0x98] sm:$0xff] }
 0x27c   : > { %v2464_v48 = vmul.f32 %v2432_v28, %v2400_v24  ;;  %v2443_v24 = vld [vmem:[%s4006_s24 + $0x80] sm:$0xff] }
 0x27d   : > { %v3056_v32 = vpack.c.bf16 %v2466_v1, %v2465_v63  ;;  %v2444_v1 = vld [vmem:[%s4006_s24 + $0x88] sm:$0xff] }
 0x27e   : > { %v3051_v12 = vpack.c.bf16 %v2464_v48, %v2463_v54 }
 0x27f   : > { %3120 = vst [vmem:[%s4457_s26 + $0x18] sm:$0xff] %v3056_v32  }
 0x280   : > { %3119 = vst [vmem:[%s4457_s26 + $0x10] sm:$0xff] %v3051_v12  }
 0x284   : > { %v3437_v3 = vpop.f32.mrb[40].mxu0 }
 0x285   : > { %v2373_v27 = vadd.f32 %v3437_v3, %v4446_v19  ;;  %v2261_v4 = vpop.f32.mrb[41].mxu0 }
 0x286   : > { %v2371_v57 = vadd.f32 %v4446_v19, %v2261_v4  ;;  %v3438_v6 = vpop.f32.mrb[42].mxu0 }
 0x287   : > { %v2405_v52 = vmax.f32 %v2373_v27, 0.0  ;;  %v2374_v7 = vadd.f32 %v3438_v6, %v4446_v19  ;;  %v2264_v9 = vpop.f32.mrb[43].mxu0 }
 0x288   : > { %v2403_v10 = vmax.f32 %v2371_v57, 0.0  ;;  %v2372_v46 = vadd.f32 %v4446_v19, %v2264_v9 }
 0x289   : > { %v2406_v15 = vmax.f32 %v2374_v7, 0.0  ;;  %v2469_v61 = vmul.f32 %v2437_v55, %v2405_v52 }
 0x28a   : > { %v2404_v18 = vmax.f32 %v2372_v46, 0.0  ;;  %v2467_v2 = vmul.f32 %v2435_v13, %v2403_v10  ;;  %v2449_v46 = vld [vmem:[%s4006_s24 + $0xb0] sm:$0xff] }
 0x28b   : > { %v2470_v30 = vmul.f32 %v2438_v11, %v2406_v15  ;;  %v2450_v15 = vld [vmem:[%s4006_s24 + $0xb8] sm:$0xff] }
 0x28c   : > { %v2468_v21 = vmul.f32 %v2436_v50, %v2404_v18  ;;  %v2447_v18 = vld [vmem:[%s4006_s24 + $0xa0] sm:$0xff] }
 0x28d   : > { %v3066_v22 = vpack.c.bf16 %v2470_v30, %v2469_v61  ;;  %v2448_v30 = vld [vmem:[%s4006_s24 + $0xa8] sm:$0xff] }
 0x28e   : > { %v3061_v20 = vpack.c.bf16 %v2468_v21, %v2467_v2 }
 0x28f   : > { %3122 = vst [vmem:[%s4457_s26 + $0x28] sm:$0xff] %v3066_v22  }
 0x290   : > { %3121 = vst [vmem:[%s4457_s26 + $0x20] sm:$0xff] %v3061_v20  }
 0x294   : > { %v3441_v26 = vpop.f32.mrb[44].mxu0 }
 0x295   : > { %v2377_v5 = vadd.f32 %v3441_v26, %v4446_v19  ;;  %v2277_v33 = vpop.f32.mrb[45].mxu0 }
 0x296   : > { %v2375_v29 = vadd.f32 %v4446_v19, %v2277_v33  ;;  %v3442_v60 = vpop.f32.mrb[46].mxu0 }
 0x297   : > { %v2409_v25 = vmax.f32 %v2377_v5, 0.0  ;;  %v2378_v36 = vadd.f32 %v3442_v60, %v4446_v19  ;;  %v2280_v31 = vpop.f32.mrb[47].mxu0 }
 0x298   : > { %v2407_v35 = vmax.f32 %v2375_v29, 0.0  ;;  %v2376_v0 = vadd.f32 %v4446_v19, %v2280_v31 }
 0x299   : > { %v2410_v38 = vmax.f32 %v2378_v36, 0.0  ;;  %v2473_v42 = vmul.f32 %v2441_v34, %v2409_v25 }
 0x29a   : > { %v2408_v39 = vmax.f32 %v2376_v0, 0.0  ;;  %v2471_v23 = vmul.f32 %v2439_v40, %v2407_v35  ;;  %v2453_v0 = vld [vmem:[%s4006_s24 + $0xd0] sm:$0xff] }
 0x29b   : > { %v2474_v41 = vmul.f32 %v2442_v16, %v2410_v38  ;;  %v2454_v38 = vld [vmem:[%s4006_s24 + $0xd8] sm:$0xff] }
 0x29c   : > { %v2472_v44 = vmul.f32 %v2440_v14, %v2408_v39  ;;  %v2451_v39 = vld [vmem:[%s4006_s24 + $0xc0] sm:$0xff] }
 0x29d   : > { %v3076_v17 = vpack.c.bf16 %v2474_v41, %v2473_v42  ;;  %v2452_v41 = vld [vmem:[%s4006_s24 + $0xc8] sm:$0xff] }
 0x29e   : > { %v3071_v47 = vpack.c.bf16 %v2472_v44, %v2471_v23 }
 0x29f   : > { %3124 = vst [vmem:[%s4457_s26 + $0x38] sm:$0xff] %v3076_v17  }
 0x2a0   : > { %3123 = vst [vmem:[%s4457_s26 + $0x30] sm:$0xff] %v3071_v47  }
 0x2a4   : > { %v3445_v49 = vpop.f32.mrb[48].mxu0 }
 0x2a5   : > { %v2381_v45 = vadd.f32 %v3445_v49, %v4446_v19  ;;  %v2293_v51 = vpop.f32.mrb[49].mxu0 }
 0x2a6   : > { %v2379_v37 = vadd.f32 %v4446_v19, %v2293_v51  ;;  %v3446_v53 = vpop.f32.mrb[50].mxu0 }
 0x2a7   : > { %v2413_v56 = vmax.f32 %v2381_v45, 0.0  ;;  %v2382_v58 = vadd.f32 %v3446_v53, %v4446_v19  ;;  %v2296_v59 = vpop.f32.mrb[51].mxu0 }
 0x2a8   : > { %v2411_v62 = vmax.f32 %v2379_v37, 0.0  ;;  %v2380_v28 = vadd.f32 %v4446_v19, %v2296_v59 }
 0x2a9   : > { %v2414_v63 = vmax.f32 %v2382_v58, 0.0  ;;  %v2477_v48 = vmul.f32 %v2445_v43, %v2413_v56 }
 0x2aa   : > { %v2412_v54 = vmax.f32 %v2380_v28, 0.0  ;;  %v2475_v12 = vmul.f32 %v2443_v24, %v2411_v62  ;;  %v2457_v28 = vld [vmem:[%s4006_s24 + $0xf0] sm:$0xff] }
 0x2ab   : > { %v2478_v32 = vmul.f32 %v2446_v8, %v2414_v63  ;;  %v2458_v63 = vld [vmem:[%s4006_s24 + $0xf8] sm:$0xff] }
 0x2ac   : > { %v2476_v3 = vmul.f32 %v2444_v1, %v2412_v54  ;;  %v2455_v54 = vld [vmem:[%s4006_s24 + $0xe0] sm:$0xff] }
 0x2ad   : > { %v3086_v27 = vpack.c.bf16 %v2478_v32, %v2477_v48  ;;  %v2456_v32 = vld [vmem:[%s4006_s24 + $0xe8] sm:$0xff]  ;;  %s3753_s24 = scalar_lea.vmem %s4536_s12, 2048 }
 0x2ae   : > { %v3081_v4 = vpack.c.bf16 %v2476_v3, %v2475_v12  ;;  %p3754_p9 = scmp.ne.s32.totalorder %s4536_s12, %s3753_s24  ;;  %p3761_p2 = scmp.lt.s32.totalorder %s3759_s7, %s3753_s24 }
 0x2af   : > { %3126 = vst [vmem:[%s4457_s26 + $0x48] sm:$0xff] %v3086_v27  }
 0x2b0   : > { %3125 = vst [vmem:[%s4457_s26 + $0x40] sm:$0xff] %v3081_v4   ;;  %p3755_p0 = pnand %p3754_p9, %p4605_p11  ;;  %p3762_p5 = por %p3761_p2, %p3760_p13 }
 0x2b2   : > { %p3756_p6 = pneg %p3755_p0 }
 0x2b4   : > { %v3449_v57 = vpop.f32.mrb[52].mxu0  ;;  %p3763_p4 = pnand %p3762_p5, %p3756_p6 }
 0x2b5   : > { %v2385_v6 = vadd.f32 %v3449_v57, %v4446_v19  ;;  %v2309_v52 = vpop.f32.mrb[53].mxu0 }
 0x2b6   : > { %v2383_v7 = vadd.f32 %v4446_v19, %v2309_v52  ;;  %v3450_v9 = vpop.f32.mrb[54].mxu0 }
 0x2b7   : > { %v2417_v55 = vmax.f32 %v2385_v6, 0.0  ;;  %v2386_v10 = vadd.f32 %v3450_v9, %v4446_v19  ;;  %v2312_v11 = vpop.f32.mrb[55].mxu0 }
 0x2b8   : > { %v2415_v13 = vmax.f32 %v2383_v7, 0.0  ;;  %v2384_v50 = vadd.f32 %v4446_v19, %v2312_v11 }
 0x2b9   : > { %v2418_v61 = vmax.f32 %v2386_v10, 0.0  ;;  %v2481_v21 = vmul.f32 %v2449_v46, %v2417_v55 }
 0x2ba   : > { %v2416_v2 = vmax.f32 %v2384_v50, 0.0  ;;  %v2479_v20 = vmul.f32 %v2447_v18, %v2415_v13 }
 0x2bb   : > { %v2482_v22 = vmul.f32 %v2450_v15, %v2418_v61 }
 0x2bc   : > { %v2480_v26 = vmul.f32 %v2448_v30, %v2416_v2 }
 0x2bd   : > { %v3096_v5 = vpack.c.bf16 %v2482_v22, %v2481_v21 }
 0x2be   : > { %v3091_v33 = vpack.c.bf16 %v2480_v26, %v2479_v20 }
 0x2bf   : > { %3128 = vst [vmem:[%s4457_s26 + $0x58] sm:$0xff] %v3096_v5  }
 0x2c0   : > { %3127 = vst [vmem:[%s4457_s26 + $0x50] sm:$0xff] %v3091_v33  }
 0x2c4   : > { %v3453_v29 = vpop.f32.mrb[56].mxu0 }
 0x2c5   : > { %v2389_v60 = vadd.f32 %v3453_v29, %v4446_v19  ;;  %v2325_v25 = vpop.f32.mrb[57].mxu0 }
 0x2c6   : > { %v2387_v36 = vadd.f32 %v4446_v19, %v2325_v25  ;;  %v3454_v31 = vpop.f32.mrb[58].mxu0 }
 0x2c7   : > { %v2421_v34 = vmax.f32 %v2389_v60, 0.0  ;;  %v2390_v35 = vadd.f32 %v3454_v31, %v4446_v19  ;;  %v2328_v16 = vpop.f32.mrb[59].mxu0 }
 0x2c8   : > { %v2419_v40 = vmax.f32 %v2387_v36, 0.0  ;;  %v2388_v14 = vadd.f32 %v4446_v19, %v2328_v16 }
 0x2c9   : > { %v2422_v42 = vmax.f32 %v2390_v35, 0.0  ;;  %v2485_v44 = vmul.f32 %v2453_v0, %v2421_v34 }
 0x2ca   : > { %v2420_v23 = vmax.f32 %v2388_v14, 0.0  ;;  %v2483_v47 = vmul.f32 %v2451_v39, %v2419_v40 }
 0x2cb   : > { %v2486_v17 = vmul.f32 %v2454_v38, %v2422_v42 }
 0x2cc   : > { %v2484_v49 = vmul.f32 %v2452_v41, %v2420_v23 }
 0x2cd   : > { %v3106_v45 = vpack.c.bf16 %v2486_v17, %v2485_v44 }
 0x2ce   : > { %v3101_v51 = vpack.c.bf16 %v2484_v49, %v2483_v47 }
 0x2cf   : > { %3130 = vst [vmem:[%s4457_s26 + $0x68] sm:$0xff] %v3106_v45  }
 0x2d0   : > { %3129 = vst [vmem:[%s4457_s26 + $0x60] sm:$0xff] %v3101_v51  }
 0x2d4   : > { %v3457_v37 = vpop.f32.mrb[60].mxu0 }
 0x2d5   : > { %v2393_v53 = vadd.f32 %v3457_v37, %v4446_v19  ;;  %v2341_v56 = vpop.f32.mrb[61].mxu0 }
 0x2d6   : > { %v2391_v58 = vadd.f32 %v4446_v19, %v2341_v56  ;;  %v3458_v59 = vpop.f32.mrb[62].mxu0 }
 0x2d7   : > { %v2425_v43 = vmax.f32 %v2393_v53, 0.0  ;;  %v2394_v62 = vadd.f32 %v3458_v59, %v4446_v19  ;;  %v2344_v8 = vpop.f32.mrb[63].mxu0 }
 0x2d8   : > { %v2423_v24 = vmax.f32 %v2391_v58, 0.0  ;;  %v2392_v1 = vadd.f32 %v4446_v19, %v2344_v8 }
 0x2d9   : > { %v2426_v48 = vmax.f32 %v2394_v62, 0.0  ;;  %v2489_v3 = vmul.f32 %v2457_v28, %v2425_v43 }
 0x2da   : > { %v2424_v12 = vmax.f32 %v2392_v1, 0.0  ;;  %v2487_v4 = vmul.f32 %v2455_v54, %v2423_v24 }
 0x2db   : > { %v2490_v27 = vmul.f32 %v2458_v63, %v2426_v48 }
 0x2dc   : > { %v2488_v57 = vmul.f32 %v2456_v32, %v2424_v12 }
 0x2dd   : > { %v3116_v6 = vpack.c.bf16 %v2490_v27, %v2489_v3 }
 0x2de   : > { %v3111_v19 = vpack.c.bf16 %v2488_v57, %v2487_v4 }
 0x2df   : > { %3132 = vst [vmem:[%s4457_s26 + $0x78] sm:$0xff] %v3116_v6  }
 0x2e0   : > { %3131 = vst [vmem:[%s4457_s26 + $0x70] sm:$0xff] %v3111_v19  }
 0x2e1   : > { %3766 = shalt.err (!%p3763_p4)
}
 0x2e2   : > { %s3767_s21 = scalar_lea.hbm %s4534_s23, 2048  ;;  %s3771_s17 = scalar_lea.hbm %s4595_s8, 4096 }
 0x2e3   : > { %p3768_p7 = scmp.ne.s32.totalorder %s4534_s23, %s3767_s21  ;;  %p3772_p1 = scmp.lt.u32.totalorder %s4534_s23, %s4595_s8 }
 0x2e4   : > { %p3773_p3 = scmp.lt.u32.totalorder %s3771_s17, %s3767_s21  ;;  %p3775_p9 = scmp.lt.u32.totalorder %s3767_s21, %s4534_s23 }
 0x2e5   : > { %p3769_p10 = pnand %p3768_p7, %p4605_p11 }
 0x2e6   : > { %p3774_p8 = por %p3773_p3, %p3772_p1 }
 0x2e7   : > { %p3770_p12 = pneg %p3769_p10 }
 0x2e8   : > { %p3776_p0 = por %p3775_p9, %p3774_p8 }
 0x2ea   : > { %p3777_p6 = pnand %p3776_p0, %p3770_p12 }
 0x2ec   : > { %3780 = shalt.err (!%p3777_p6)
}
 0x2ed   : > { %s3843_s24 = smov 64   ;;  %s3844_s14 = smov 4  }
 0x2ee   : > { %3511 = dma.vmem_to_hbm [thread:$0]  (%p4605_p11), %s4536_s12, 2048, %s4534_s23, %s2652_s30, %s3843_s24, %s3843_s24, %s3844_s14  }
 0x2ef PF: > { %s2680_s15 = sand.u32 1, %s3815_s27   ;;  %p4606_p13 = scmp.ne.s32.totalorder %s4601_s20, 0 }
 0x2f0   : > { %p4607_p2 = scmp.ge.s32.totalorder %s3835_s10, 2  ;;  %s2681_s7 = scalar_lea.sflag [#allocation5], %s2680_s15 }
 0x2f2   : > { %p3518_p5 = pnand %p4607_p2, %p4606_p13 }
 0x2f4   : > { %3810 = dma.done.wait (!%p3518_p5), %s2681_s7, 2048  }
 0x2f5   : > { %3812 = vsyncadd (!%p3518_p5), %s2681_s7, 4294965248  ;;  %s24_s10 = sadd.s32 1, %s3835_s10   ;;  %s4608_s27 = smov %s3819_s28 }
 0x2f6   : > { %p21_p4 = scmp.ge.s32.totalorder %s24_s10, 4   ;;  %s4609_s28 = smov %s3823_s29 }
 0x2f7   : > { %s4610_s29 = smov %s3946_s19  ;;  %s4611_s30 = smov %s3831_s9 }
 0x2f8   : > { %s4612_s9 = smov %s4614_s13  ;;  %23 = sbr.rel (!%p21_p4) target bundleno = 8 (0x8), region = 117 }
 0x2ff   :  { %2686 = vsyncpa [#allocation4], 1 }
 0x300   :  { %2688 = vsyncpa [#allocation4 + $0x1], 1 }
 0x301   :  { %2689 = vsyncpa [#allocation5], 1 }
 0x302   :  { %2691 = vsyncpa [#allocation5 + $0x1], 1 }

</bundles_post_ra>
